<compile_context>
chip_gen: v7x
topology: tpu7x:2x2x1
jax: 0.10.0
libtpu: 0.0.40
codegen_flags: <defaults>
</compile_context>

<pallas_src>
import functools

import jax
import jax.numpy as jnp
from jax import lax
from jax.experimental import pallas as pl
from jax.experimental.pallas import tpu as pltpu


# ----------------------------------------------------------------------------
# Fused kernel: conv3x3 + bias + ReLU  ->  mean over H  ->  Linear + tanh
# One grid step == one image.
#
#   x_ref  : [1, W+2, (H+2)*Cin]  padded input, rows = x(width) positions,
#                                 cols = y*Cin + ci (lane-dense), compute dtype
#   bdw_ref: [9, H*Cin, H*Cout]   per-tap block-diagonal conv weights, compute dtype
#   cb_ref : [1, H*Cout]          conv bias tiled over H (f32)
#   sw_ref : [H*Cout, HID]        tile(seq_w, (H,1)) / H  (1/H folded in), compute dtype
#   sb_ref : [1, HID]             sequence bias (f32)
#   o_ref  : [1, W, HID]
# ----------------------------------------------------------------------------
def _aster_fused_kernel(x_ref, bdw_ref, cb_ref, sw_ref, sb_ref, o_ref, *,
                        h, w, cin, cout):
    x = x_ref[0]                                           # [W+2, (H+2)*Cin]
    acc = jnp.zeros((w, h * cout), jnp.float32)
    # 3x3 conv as 9 shifted matmuls (static unroll), f32 accumulation on the MXU.
    for kh in range(3):
        for kw in range(3):
            tap = x[kw:kw + w, kh * cin:kh * cin + h * cin]          # [W, H*Cin]
            acc = acc + jnp.dot(tap, bdw_ref[kh * 3 + kw],
                                preferred_element_type=jnp.float32)
    # bias + ReLU epilogue in f32 (v5e-safe), on a full-128-lane [W, H*Cout] tile.
    feat = jnp.maximum(acc + cb_ref[...], 0.0)
    # AdaptiveAvgPool over H + sequence Linear fused into one matmul
    # (1/H already folded into sw), then bias + tanh.
    hid = jnp.dot(feat.astype(sw_ref.dtype), sw_ref[...],
                  preferred_element_type=jnp.float32) + sb_ref[...]
    o_ref[0] = jnp.tanh(hid).astype(o_ref.dtype)           # [W, HID]


# ----------------------------------------------------------------------------
# Wrapper: layout plumbing on the (small) input and (tiny) weights only.
# ----------------------------------------------------------------------------
@functools.partial(jax.jit, static_argnames=("compute_dtype",))
def aster_encoder_forward(img, conv_w, conv_b, seq_w, seq_b,
                          compute_dtype=jnp.float32):
    """img: [N, Cin, H, W] (NCHW like PyTorch). Returns [N, W, HID]."""
    n, cin, h, w = img.shape
    cout = conv_w.shape[0]
    hid = seq_w.shape[1]

    # Per-image kernel layout: [W+2, (H+2)*Cin] (lane-dense on y*Cin+ci).
    x = jnp.transpose(img, (0, 3, 2, 1))                             # [N, W, H, Cin]
    x = jnp.pad(x, ((0, 0), (1, 1), (1, 1), (0, 0)))                 # [N, W+2, H+2, Cin]
    x2d = x.reshape(n, w + 2, (h + 2) * cin).astype(compute_dtype)

    # Per-tap block-diagonal conv weights:
    #   BD[kh*3+kw, y*Cin+ci, y*Cout+co] = conv_w[co, ci, kh, kw]
    w_taps = jnp.transpose(conv_w, (2, 3, 1, 0)).reshape(9, cin, cout)
    bdw = jnp.einsum("ab,tio->taibo", jnp.eye(h, dtype=conv_w.dtype), w_taps)
    bdw = bdw.reshape(9, h * cin, h * cout).astype(compute_dtype)

    cb = jnp.tile(conv_b, h).reshape(1, h * cout).astype(jnp.float32)
    # Pooling (mean over H) folded into the sequence weight at trace time.
    sw = (jnp.tile(seq_w, (h, 1)) / h).astype(compute_dtype)          # [H*Cout, HID]
    sb = seq_b.reshape(1, hid).astype(jnp.float32)

    kernel = functools.partial(_aster_fused_kernel, h=h, w=w, cin=cin, cout=cout)
    out = pl.pallas_call(
        kernel,
        out_shape=jax.ShapeDtypeStruct((n, w, hid), jnp.float32),
        grid_spec=pltpu.PrefetchScalarGridSpec(
            num_scalar_prefetch=0,
            grid=(n,),
            in_specs=[
                pl.BlockSpec((1, w + 2, (h + 2) * cin), lambda i: (i, 0, 0)),
                pl.BlockSpec((9, h * cin, h * cout), lambda i: (0, 0, 0)),
                pl.BlockSpec((1, h * cout), lambda i: (0, 0)),
                pl.BlockSpec((h * cout, hid), lambda i: (0, 0)),
                pl.BlockSpec((1, hid), lambda i: (0, 0)),
            ],
            out_specs=pl.BlockSpec((1, w, hid), lambda i: (i, 0, 0)),
        ),
        compiler_params=pltpu.CompilerParams(
            dimension_semantics=("parallel",),          # v7x: shard batch over 2 TCs
            vmem_limit_bytes=32 * 1024 * 1024,          # explicit, safe on v5e/v6e/v7x
        ),
    )(x2d, bdw, cb, sw, sb)
    return out


# ----------------------------------------------------------------------------
# AsterEncoder wrapper (keeps the dict-in / dict-out interface of the module)
# ----------------------------------------------------------------------------
class AsterEncoderPallas:
    def __init__(self, c_in=4, c_out=32, hidden=32, key=jax.random.PRNGKey(0),
                 compute_dtype=jnp.float32):
        k1, k2, k3, k4 = jax.random.split(key, 4)
        self.conv_w = 0.1 * jax.random.normal(k1, (c_out, c_in, 3, 3), jnp.float32)
        self.conv_b = 0.1 * jax.random.normal(k2, (c_out,), jnp.float32)
        self.seq_w = 0.1 * jax.random.normal(k3, (c_out, hidden), jnp.float32)
        self.seq_b = 0.1 * jax.random.normal(k4, (hidden,), jnp.float32)
        self.compute_dtype = compute_dtype

    def __call__(self, data: dict):
        data = dict(data)
        # Transformation stage (TPS) -> identity.
        # TODO(synk): TPS spatial transformer (grid_sample) has no clean Pallas equivalent.
        data['img'] = aster_encoder_forward(
            data['img'], self.conv_w, self.conv_b, self.seq_w, self.seq_b,
            compute_dtype=self.compute_dtype)
        return data


# ----------------------------------------------------------------------------
# Pure-JAX reference for validation
# ----------------------------------------------------------------------------
def reference_forward(x, conv_w, conv_b, seq_w, seq_b):
    y = lax.conv_general_dilated(
        x, conv_w, window_strides=(1, 1), padding='SAME',
        dimension_numbers=('NCHW', 'OIHW', 'NCHW'))
    y = jnp.maximum(y + conv_b[None, :, None, None], 0.0)       # [N,Cout,H,W]
    # permute(0,3,1,2) -> [N,W,Cout,H]; AdaptiveAvgPool2d((None,1)) -> mean over H
    pooled = jnp.mean(jnp.transpose(y, (0, 3, 1, 2)), axis=3)   # [N,W,Cout]
    return jnp.tanh(pooled @ seq_w + seq_b)                     # [N,W,HID]


if __name__ == "__main__":
    key = jax.random.PRNGKey(0)
    k_img, k_params = jax.random.split(key)

    N, C_IN, H, W = 2, 4, 16, 16
    img = jax.random.normal(k_img, (N, C_IN, H, W), jnp.float32)

    enc = AsterEncoderPallas(c_in=C_IN, c_out=32, hidden=32, key=k_params)

    out = enc({'img': img})
    result = jax.block_until_ready(out['img'])
    assert result.shape == (N, W, 32), result.shape

    ref = jax.block_until_ready(
        reference_forward(img, enc.conv_w, enc.conv_b, enc.seq_w, enc.seq_b))
    assert jnp.allclose(result, ref, rtol=1e-4, atol=1e-4), (
        float(jnp.max(jnp.abs(result - ref))))

    # bf16 matmul operands + f32 accumulation (v6e/v5e HBM-byte saving); looser
    # tolerance only because of bf16 operand rounding.
    result_bf16 = jax.block_until_ready(
        aster_encoder_forward(img, enc.conv_w, enc.conv_b, enc.seq_w, enc.seq_b,
                              compute_dtype=jnp.bfloat16))
    assert jnp.allclose(result_bf16, ref, atol=5e-2), (
        float(jnp.max(jnp.abs(result_bf16 - ref))))

    print("KERNEL_OK")
</pallas_src>

<mosaic_0001>
module attributes {stable_mosaic.version = 11 : i64} {
  func.func @_aster_fused_kernel(%arg0: i32, %arg1: memref<1x18x72xf32, #tpu.memory_space<vmem>>, %arg2: memref<9x64x512xf32, #tpu.memory_space<vmem>>, %arg3: memref<1x512xf32, #tpu.memory_space<vmem>>, %arg4: memref<512x32xf32, #tpu.memory_space<vmem>>, %arg5: memref<1x32xf32, #tpu.memory_space<vmem>>, %arg6: memref<1x16x32xf32, #tpu.memory_space<vmem>>) attributes {dimension_semantics = [#tpu.dimension_semantics<parallel>], iteration_bounds = array<i64: 2>, scalar_prefetch = 0 : i64, scratch_operands = 0 : i64, tpu.core_type = #tpu.core_type<tc>, window_params = [{transform_indices = @transform_0, window_bounds = array<i64: 1, 18, 72>}, {pipeline_mode = #tpu.pipeline_mode<synchronous>, transform_indices = @transform_1, window_bounds = array<i64: 9, 64, 512>}, {pipeline_mode = #tpu.pipeline_mode<synchronous>, transform_indices = @transform_2, window_bounds = array<i64: 1, 512>}, {pipeline_mode = #tpu.pipeline_mode<synchronous>, transform_indices = @transform_3, window_bounds = array<i64: 512, 32>}, {pipeline_mode = #tpu.pipeline_mode<synchronous>, transform_indices = @transform_4, window_bounds = array<i64: 1, 32>}, {transform_indices = @transform_5, window_bounds = array<i64: 1, 16, 32>}]} {
    %c0 = arith.constant 0 : index
    %c0_0 = arith.constant 0 : index
    %c0_1 = arith.constant 0 : index
    %0 = vector.load %arg1[%c0, %c0_0, %c0_1] : memref<1x18x72xf32, #tpu.memory_space<vmem>>, vector<1x18x72xf32>
    %1 = vector.shape_cast %0 : vector<1x18x72xf32> to vector<18x72xf32>
    %cst = arith.constant 0.000000e+00 : f32
    %2 = vector.broadcast %cst : f32 to vector<16x512xf32>
    %3 = vector.extract_strided_slice %1 {offsets = [0, 0], sizes = [16, 64], strides = [1, 1]} : vector<18x72xf32> to vector<16x64xf32>
    %c0_2 = arith.constant 0 : index
    %c0_3 = arith.constant 0 : index
    %c0_4 = arith.constant 0 : index
    %4 = vector.load %arg2[%c0_2, %c0_3, %c0_4] : memref<9x64x512xf32, #tpu.memory_space<vmem>>, vector<1x64x512xf32>
    %5 = vector.shape_cast %4 : vector<1x64x512xf32> to vector<64x512xf32>
    %cst_5 = arith.constant dense<0.000000e+00> : vector<16x512xf32>
    %6 = tpu.matmul %3, %5, %cst_5 {dimension_numbers = #tpu.dot_dimension_numbers<[1], [0], [0], [1], [0, 0, 1, 1], [], []>} : vector<16x64xf32>, vector<64x512xf32>, vector<16x512xf32> -> vector<16x512xf32>
    %7 = arith.addf %2, %6 : vector<16x512xf32>
    %8 = vector.extract_strided_slice %1 {offsets = [1, 0], sizes = [16, 64], strides = [1, 1]} : vector<18x72xf32> to vector<16x64xf32>
    %c1 = arith.constant 1 : index
    %c0_6 = arith.constant 0 : index
    %c0_7 = arith.constant 0 : index
    %9 = vector.load %arg2[%c1, %c0_6, %c0_7] : memref<9x64x512xf32, #tpu.memory_space<vmem>>, vector<1x64x512xf32>
    %10 = vector.shape_cast %9 : vector<1x64x512xf32> to vector<64x512xf32>
    %cst_8 = arith.constant dense<0.000000e+00> : vector<16x512xf32>
    %11 = tpu.matmul %8, %10, %cst_8 {dimension_numbers = #tpu.dot_dimension_numbers<[1], [0], [0], [1], [0, 0, 1, 1], [], []>} : vector<16x64xf32>, vector<64x512xf32>, vector<16x512xf32> -> vector<16x512xf32>
    %12 = arith.addf %7, %11 : vector<16x512xf32>
    %13 = vector.extract_strided_slice %1 {offsets = [2, 0], sizes = [16, 64], strides = [1, 1]} : vector<18x72xf32> to vector<16x64xf32>
    %c2 = arith.constant 2 : index
    %c0_9 = arith.constant 0 : index
    %c0_10 = arith.constant 0 : index
    %14 = vector.load %arg2[%c2, %c0_9, %c0_10] : memref<9x64x512xf32, #tpu.memory_space<vmem>>, vector<1x64x512xf32>
    %15 = vector.shape_cast %14 : vector<1x64x512xf32> to vector<64x512xf32>
    %cst_11 = arith.constant dense<0.000000e+00> : vector<16x512xf32>
    %16 = tpu.matmul %13, %15, %cst_11 {dimension_numbers = #tpu.dot_dimension_numbers<[1], [0], [0], [1], [0, 0, 1, 1], [], []>} : vector<16x64xf32>, vector<64x512xf32>, vector<16x512xf32> -> vector<16x512xf32>
    %17 = arith.addf %12, %16 : vector<16x512xf32>
    %18 = vector.extract_strided_slice %1 {offsets = [0, 4], sizes = [16, 64], strides = [1, 1]} : vector<18x72xf32> to vector<16x64xf32>
    %c3 = arith.constant 3 : index
    %c0_12 = arith.constant 0 : index
    %c0_13 = arith.constant 0 : index
    %19 = vector.load %arg2[%c3, %c0_12, %c0_13] : memref<9x64x512xf32, #tpu.memory_space<vmem>>, vector<1x64x512xf32>
    %20 = vector.shape_cast %19 : vector<1x64x512xf32> to vector<64x512xf32>
    %cst_14 = arith.constant dense<0.000000e+00> : vector<16x512xf32>
    %21 = tpu.matmul %18, %20, %cst_14 {dimension_numbers = #tpu.dot_dimension_numbers<[1], [0], [0], [1], [0, 0, 1, 1], [], []>} : vector<16x64xf32>, vector<64x512xf32>, vector<16x512xf32> -> vector<16x512xf32>
    %22 = arith.addf %17, %21 : vector<16x512xf32>
    %23 = vector.extract_strided_slice %1 {offsets = [1, 4], sizes = [16, 64], strides = [1, 1]} : vector<18x72xf32> to vector<16x64xf32>
    %c4 = arith.constant 4 : index
    %c0_15 = arith.constant 0 : index
    %c0_16 = arith.constant 0 : index
    %24 = vector.load %arg2[%c4, %c0_15, %c0_16] : memref<9x64x512xf32, #tpu.memory_space<vmem>>, vector<1x64x512xf32>
    %25 = vector.shape_cast %24 : vector<1x64x512xf32> to vector<64x512xf32>
    %cst_17 = arith.constant dense<0.000000e+00> : vector<16x512xf32>
    %26 = tpu.matmul %23, %25, %cst_17 {dimension_numbers = #tpu.dot_dimension_numbers<[1], [0], [0], [1], [0, 0, 1, 1], [], []>} : vector<16x64xf32>, vector<64x512xf32>, vector<16x512xf32> -> vector<16x512xf32>
    %27 = arith.addf %22, %26 : vector<16x512xf32>
    %28 = vector.extract_strided_slice %1 {offsets = [2, 4], sizes = [16, 64], strides = [1, 1]} : vector<18x72xf32> to vector<16x64xf32>
    %c5 = arith.constant 5 : index
    %c0_18 = arith.constant 0 : index
    %c0_19 = arith.constant 0 : index
    %29 = vector.load %arg2[%c5, %c0_18, %c0_19] : memref<9x64x512xf32, #tpu.memory_space<vmem>>, vector<1x64x512xf32>
    %30 = vector.shape_cast %29 : vector<1x64x512xf32> to vector<64x512xf32>
    %cst_20 = arith.constant dense<0.000000e+00> : vector<16x512xf32>
    %31 = tpu.matmul %28, %30, %cst_20 {dimension_numbers = #tpu.dot_dimension_numbers<[1], [0], [0], [1], [0, 0, 1, 1], [], []>} : vector<16x64xf32>, vector<64x512xf32>, vector<16x512xf32> -> vector<16x512xf32>
    %32 = arith.addf %27, %31 : vector<16x512xf32>
    %33 = vector.extract_strided_slice %1 {offsets = [0, 8], sizes = [16, 64], strides = [1, 1]} : vector<18x72xf32> to vector<16x64xf32>
    %c6 = arith.constant 6 : index
    %c0_21 = arith.constant 0 : index
    %c0_22 = arith.constant 0 : index
    %34 = vector.load %arg2[%c6, %c0_21, %c0_22] : memref<9x64x512xf32, #tpu.memory_space<vmem>>, vector<1x64x512xf32>
    %35 = vector.shape_cast %34 : vector<1x64x512xf32> to vector<64x512xf32>
    %cst_23 = arith.constant dense<0.000000e+00> : vector<16x512xf32>
    %36 = tpu.matmul %33, %35, %cst_23 {dimension_numbers = #tpu.dot_dimension_numbers<[1], [0], [0], [1], [0, 0, 1, 1], [], []>} : vector<16x64xf32>, vector<64x512xf32>, vector<16x512xf32> -> vector<16x512xf32>
    %37 = arith.addf %32, %36 : vector<16x512xf32>
    %38 = vector.extract_strided_slice %1 {offsets = [1, 8], sizes = [16, 64], strides = [1, 1]} : vector<18x72xf32> to vector<16x64xf32>
    %c7 = arith.constant 7 : index
    %c0_24 = arith.constant 0 : index
    %c0_25 = arith.constant 0 : index
    %39 = vector.load %arg2[%c7, %c0_24, %c0_25] : memref<9x64x512xf32, #tpu.memory_space<vmem>>, vector<1x64x512xf32>
    %40 = vector.shape_cast %39 : vector<1x64x512xf32> to vector<64x512xf32>
    %cst_26 = arith.constant dense<0.000000e+00> : vector<16x512xf32>
    %41 = tpu.matmul %38, %40, %cst_26 {dimension_numbers = #tpu.dot_dimension_numbers<[1], [0], [0], [1], [0, 0, 1, 1], [], []>} : vector<16x64xf32>, vector<64x512xf32>, vector<16x512xf32> -> vector<16x512xf32>
    %42 = arith.addf %37, %41 : vector<16x512xf32>
    %43 = vector.extract_strided_slice %1 {offsets = [2, 8], sizes = [16, 64], strides = [1, 1]} : vector<18x72xf32> to vector<16x64xf32>
    %c8 = arith.constant 8 : index
    %c0_27 = arith.constant 0 : index
    %c0_28 = arith.constant 0 : index
    %44 = vector.load %arg2[%c8, %c0_27, %c0_28] : memref<9x64x512xf32, #tpu.memory_space<vmem>>, vector<1x64x512xf32>
    %45 = vector.shape_cast %44 : vector<1x64x512xf32> to vector<64x512xf32>
    %cst_29 = arith.constant dense<0.000000e+00> : vector<16x512xf32>
    %46 = tpu.matmul %43, %45, %cst_29 {dimension_numbers = #tpu.dot_dimension_numbers<[1], [0], [0], [1], [0, 0, 1, 1], [], []>} : vector<16x64xf32>, vector<64x512xf32>, vector<16x512xf32> -> vector<16x512xf32>
    %47 = arith.addf %42, %46 : vector<16x512xf32>
    %c0_30 = arith.constant 0 : index
    %c0_31 = arith.constant 0 : index
    %48 = vector.load %arg3[%c0_30, %c0_31] : memref<1x512xf32, #tpu.memory_space<vmem>>, vector<1x512xf32>
    %49 = vector.broadcast %48 : vector<1x512xf32> to vector<16x512xf32>
    %50 = arith.addf %47, %49 : vector<16x512xf32>
    %cst_32 = arith.constant 0.000000e+00 : f32
    %51 = vector.broadcast %cst_32 : f32 to vector<16x512xf32>
    %52 = arith.maximumf %50, %51 : vector<16x512xf32>
    %c0_33 = arith.constant 0 : index
    %c0_34 = arith.constant 0 : index
    %53 = vector.load %arg4[%c0_33, %c0_34] : memref<512x32xf32, #tpu.memory_space<vmem>>, vector<512x32xf32>
    %cst_35 = arith.constant dense<0.000000e+00> : vector<16x32xf32>
    %54 = tpu.matmul %52, %53, %cst_35 {dimension_numbers = #tpu.dot_dimension_numbers<[1], [0], [0], [1], [0, 0, 1, 1], [], []>} : vector<16x512xf32>, vector<512x32xf32>, vector<16x32xf32> -> vector<16x32xf32>
    %c0_36 = arith.constant 0 : index
    %c0_37 = arith.constant 0 : index
    %55 = vector.load %arg5[%c0_36, %c0_37] : memref<1x32xf32, #tpu.memory_space<vmem>>, vector<1x32xf32>
    %56 = vector.broadcast %55 : vector<1x32xf32> to vector<16x32xf32>
    %57 = arith.addf %54, %56 : vector<16x32xf32>
    %58 = math.tanh %57 : vector<16x32xf32>
    %c0_38 = arith.constant 0 : index
    %c0_39 = arith.constant 0 : index
    %c0_40 = arith.constant 0 : index
    %59 = vector.load %arg6[%c0_38, %c0_39, %c0_40] : memref<1x16x32xf32, #tpu.memory_space<vmem>>, vector<1x16x32xf32>
    %60 = vector.shape_cast %59 : vector<1x16x32xf32> to vector<16x32xf32>
    %61 = vector.shape_cast %58 : vector<16x32xf32> to vector<1x16x32xf32>
    tpu.vector_store %arg6[%c0_38, %c0_39, %c0_40], %61 {strides = array<i32>} : memref<1x16x32xf32, #tpu.memory_space<vmem>>, vector<1x16x32xf32>,
    return
  }
  func.func @transform_0(%arg0: i32) -> (i32, i32, i32) {
    %c0_i32 = arith.constant 0 : i32
    %c0_i32_0 = arith.constant 0 : i32
    %c0_i32_1 = arith.constant 0 : i32
    return %arg0, %c0_i32, %c0_i32_0 : i32, i32, i32
  }
  func.func @transform_1(%arg0: i32) -> (i32, i32, i32) {
    %c0_i32 = arith.constant 0 : i32
    %c0_i32_0 = arith.constant 0 : i32
    %c0_i32_1 = arith.constant 0 : i32
    %c0_i32_2 = arith.constant 0 : i32
    return %c0_i32, %c0_i32_0, %c0_i32_1 : i32, i32, i32
  }
  func.func @transform_2(%arg0: i32) -> (i32, i32) {
    %c0_i32 = arith.constant 0 : i32
    %c0_i32_0 = arith.constant 0 : i32
    %c0_i32_1 = arith.constant 0 : i32
    return %c0_i32, %c0_i32_0 : i32, i32
  }
  func.func @transform_3(%arg0: i32) -> (i32, i32) {
    %c0_i32 = arith.constant 0 : i32
    %c0_i32_0 = arith.constant 0 : i32
    %c0_i32_1 = arith.constant 0 : i32
    return %c0_i32, %c0_i32_0 : i32, i32
  }
  func.func @transform_4(%arg0: i32) -> (i32, i32) {
    %c0_i32 = arith.constant 0 : i32
    %c0_i32_0 = arith.constant 0 : i32
    %c0_i32_1 = arith.constant 0 : i32
    return %c0_i32, %c0_i32_0 : i32, i32
  }
  func.func @transform_5(%arg0: i32) -> (i32, i32, i32) {
    %c0_i32 = arith.constant 0 : i32
    %c0_i32_0 = arith.constant 0 : i32
    %c0_i32_1 = arith.constant 0 : i32
    return %arg0, %c0_i32, %c0_i32_0 : i32, i32, i32
  }
}

</mosaic_0001>

<bundles_post_ra>
// kernel: tile.13
= control target key start
LH: loop header
LB: loop body
LE: loop exit
PB: predicated region body
PF: predicated region fallthrough
CT: control target
= control target key end

     0   :  { %s28_s0 = inlined_call_operand.vmem [shape: f32[32], index: 0, kind: input, shape index: {}]   ;;  %s29_s1 = inlined_call_operand.vmem [shape: f32[16,32], index: 1, kind: output, shape index: {}]  }
   0x1   :  { %v4_v0 = vld [vmem:[%s28_s0] ss:$0 sm:$0xff] }
   0x2   :  { %5 = vst [vmem:[%s29_s1] sm:$0xff] %v4_v0  ;;  %8 = vst [vmem:[%s29_s1 + $0x8] sm:$0xff] %v4_v0 }

// kernel: tile.14
= control target key start
LH: loop header
LB: loop body
LE: loop exit
PB: predicated region body
PF: predicated region fallthrough
CT: control target
= control target key end

     0   :  { %s57_s8 = smov 96   ;;  %vm3_vm0 = vcmask 261120   ;;  %s59_s15 = smov 64   ;;  %vm9_vm1 = vcmask 1048320   ;;  %vm15_vm2 = vcmask 785920   ;;  %vm21_vm3 = vcmask 523520   ;;  %s94_s0 = inlined_call_operand.vmem [shape: f32[16,32], index: 0, kind: input, shape index: {}]   ;;  %s95_s1 = inlined_call_operand.vmem [shape: f32[1,512], index: 1, kind: output, shape index: {}]  }
   0x1   :  { %v48_v0 = vld [vmem:[%s94_s0 + $0x3] ss:$4 sm:$0xf]   ;;  %v49_v1 = vld [vmem:[%s94_s0 + $0x2] ss:$4 sm:$0xf]  }
   0x2   :  { %7 = vrot.lane.b32.xlu0 %v48_v0, %s57_s8  ;;  %v50_v2 = vld [vmem:[%s94_s0 + $0x1] ss:$4 sm:$0xf]   ;;  %v2_v3 = vld [vmem:[%s94_s0] ss:$4 sm:$0xf]  }
   0x3   :  { %s58_s0 = smov 32   ;;  %4 = vst.msk [vmem:[#allocation0] ss:$8 sm:$0xf] %vm3_vm0, %v2_v3  }
   0x4   :  { %19 = vrot.lane.b32.xlu1 %v50_v2, %s58_s0 }
   0x6   :  { %13 = vrot.lane.b32.xlu0 %v49_v1, %s59_s15 }
  0x74   :  { %v8_v4 = vpop.permute.xlu0 %7  }
  0x75   :  { %10 = vst.msk [vmem:[#allocation0] ss:$8 sm:$0xf] %vm9_vm1, %v8_v4  }
  0x76   :  { %v20_v5 = vpop.permute.xlu1 %19  }
  0x78   :  { %v14_v6 = vpop.permute.xlu0 %13  }
  0x79   :  { %16 = vst.msk [vmem:[#allocation0] ss:$8 sm:$0xf] %vm15_vm2, %v14_v6  }
  0x7a   :  { %22 = vst.msk [vmem:[#allocation0] ss:$8 sm:$0xf] %vm21_vm3, %v20_v5  }
  0x81   :  { %v26_v7 = vld [vmem:[#allocation0] sm:$0x1]  ;;  %v30_v8 = vld [vmem:[#allocation0 + $0x8] sm:$0x1]  ;;  %v35_v9 = vld [vmem:[#allocation0 + $0x10] sm:$0x1] }
  0x82   :  { %28 = vst [vmem:[%s95_s1] sm:$0x1] %v26_v7  ;;  %51 = vst [vmem:[%s95_s1 + $0x1] sm:$0x1] %v30_v8  ;;  %v41_v10 = vld [vmem:[#allocation0 + $0x18] sm:$0x1] }
  0x83   :  { %52 = vst [vmem:[%s95_s1 + $0x2] sm:$0x1] %v35_v9  ;;  %53 = vst [vmem:[%s95_s1 + $0x3] sm:$0x1] %v41_v10 }

// kernel: aster_encoder_forward.1
= control target key start
LH: loop header
LB: loop body
LE: loop exit
PB: predicated region body
PF: predicated region fallthrough
CT: control target
= control target key end

     0   :  { %10 = vsyncpa [#allocation3], 0  ;;  %s4619_s0 = inlined_call_operand.vmem [shape: f32[2,18,72], index: 0, kind: input, shape index: {}]   ;;  %s4620_s1 = inlined_call_operand.vmem [shape: f32[9,64,512], index: 1, kind: input, shape index: {}]   ;;  %s4621_s2 = inlined_call_operand.vmem [shape: f32[1,512], index: 2, kind: input, shape index: {}]   ;;  %s4622_s3 = inlined_call_operand.vmem [shape: f32[512,32], index: 3, kind: input, shape index: {}]   ;;  %s4623_s4 = inlined_call_operand.vmem [shape: f32[1,32], index: 4, kind: input, shape index: {}]   ;;  %s4624_s5 = inlined_call_operand.hbm [shape: f32[2,16,32], index: 5, kind: output, shape index: {}]  }
   0x1   :  { %12 = vsyncpa [#allocation3 + $0x1], 0  ;;  %s3326_s18 = smov 0   ;;  %s3328_s19 = smov 0  }
   0x2   :  { %s3330_s20 = smov 0   ;;  %s3332_s21 = smov 0  }
   0x3 LB: > { %s3347_s22 = sadd.s32 4294967295, %s3288_s21   ;;  %s2380_s23 = sadd.s32 4294967294, %s3288_s21   ;;  %s3288_s21 = sphi %s3332_s21, %s4630_s21   ;;  %s3284_s20 = sphi %s3330_s20, %s4629_s20   ;;  %s3280_s19 = sphi %s3328_s19, %s4628_s19   ;;  %s3276_s18 = sphi %s3326_s18, %s4627_s18  }
   0x4   : > { %s3351_s24 = sadd.s32 1, %s3288_s21   ;;  %s135_s25 = sadd.s32 1, %s3284_s20 }
   0x5   : > { %s132_s26 = ssub.s32 %s3288_s21, %s3351_s24  ;;  %p145_p0 = scmp.ne.s32.totalorder %s3284_s20, %s3280_s19 }
   0x6   : > { %p133_p1 = scmp.eq.s32.totalorder %s132_s26, 0  ;;  %p146_p2 = scmp.eq.s32.totalorder %s3347_s22, 1 }
   0x7   : > { %p151_p3 = scmp.ne.s32.totalorder %s3280_s19, %s3276_s18  ;;  %p152_p4 = scmp.eq.s32.totalorder %s2380_s23, 1 }
   0x8   : > { %s3362_s27 = scalar_select %p133_p1, %s3284_s20, %s135_s25  }
   0x9   : > { %p3364_p5 = por %p146_p2, %p145_p0  ;;  %p3368_p6 = por %p152_p4, %p151_p3 }
   0xa   : > { %p2383_p7 = scmp.ge.s32.totalorder %s3288_s21, 1  ;;  %p190_p8 = scmp.lt.s32.totalorder %s3288_s21, 3 }
   0xc   : > { %p191_p9 = pnand %p2383_p7, %p190_p8 }
   0xd   : > { %p218_p10 = scmp.lt.s32.totalorder (!%p191_p9), %s3347_s22, 1  ;;  %v2387_v0 = vld [vmem:[%s4620_s1 + $0x108] sm:$0xff] (!%p191_p9)  ;;  %v2389_v3 = vld [vmem:[%s4620_s1 + $0x118] sm:$0xff] (!%p191_p9)  ;;  %v2386_v5 = vld [vmem:[%s4620_s1 + $0x100] sm:$0xff] (!%p191_p9)  ;;  %v3290_v10 = vmov (!%p191_p9), 0.0   ;;  %vm294_vm0 = vcmask (!%p191_p9), 1046528  }
   0xe   : > { %194 = sbr.rel (%p191_p9) target bundleno = 689 (0x2b1), region = 40  ;;  %v2391_v1 = vld [vmem:[%s4620_s1 + $0x128] sm:$0xff] (!%p191_p9)  ;;  %v2393_v4 = vld [vmem:[%s4620_s1 + $0x138] sm:$0xff] (!%p191_p9)  ;;  %v2390_v7 = vld [vmem:[%s4620_s1 + $0x120] sm:$0xff] (!%p191_p9)  ;;  %369 = vmatprep.mubr.f32.mxu0 (!%p191_p9), %v3290_v10  ;;  %446 = vmatprep.mubr.f32.mxu1 (!%p191_p9), %v3290_v10  ;;  %vm650_vm1 = vcmask (!%p191_p9), 1045504   ;;  %vm300_vm2 = vcmask (!%p191_p9), 523264  }
   0xf   : > { %v2761_v2 = vpack.c.bf16 (!%p191_p9), %v2391_v1, %v2387_v0  ;;  %v2777_v6 = vpack.c.bf16 (!%p191_p9), %v2393_v4, %v2389_v3  ;;  %v2388_v8 = vld [vmem:[%s4620_s1 + $0x110] sm:$0xff] (!%p191_p9)  ;;  %v2763_v11 = vpack.c.bf16 (!%p191_p9), %v2390_v7, %v2386_v5  ;;  %v2395_v13 = vld [vmem:[%s4620_s1 + $0x148] sm:$0xff] (!%p191_p9)  ;;  %v2397_v15 = vld [vmem:[%s4620_s1 + $0x158] sm:$0xff] (!%p191_p9)  ;;  %s3292_s26 = smov (!%p191_p9), 120   ;;  %s215_s6 = sand.u32 (!%p191_p9), 1, %s3280_s19   ;;  %vm2301_vm3 = vcmask (!%p191_p9), 261120  }
  0x10   : > { %v2392_v9 = vld [vmem:[%s4620_s1 + $0x130] sm:$0xff] (!%p191_p9)  ;;  %v2399_v14 = vld [vmem:[%s4620_s1 + $0x168] sm:$0xff] (!%p191_p9)  ;;  %v2401_v17 = vld [vmem:[%s4620_s1 + $0x178] sm:$0xff] (!%p191_p9)  ;;  %s2384_s7 = sshll.u32 (!%p191_p9), %s215_s6, 4  ;;  %s2684_s8 = sshll.u32 (!%p191_p9), %s3347_s22, 8 }
  0x11   : > { %2762 = vmatprep.subr.bf16.mxu0 (!%p191_p9), %v2761_v2  ;;  %v2779_v12 = vpack.c.bf16 (!%p191_p9), %v2392_v9, %v2388_v8  ;;  %2778 = vmatprep.subr.bf16.mxu1 (!%p191_p9), %v2777_v6  ;;  %v2765_v16 = vpack.c.bf16 (!%p191_p9), %v2399_v14, %v2395_v13  ;;  %v2394_v18 = vld [vmem:[%s4620_s1 + $0x140] sm:$0xff] (!%p191_p9)  ;;  %v2781_v20 = vpack.c.bf16 (!%p191_p9), %v2401_v17, %v2397_v15  ;;  %v2396_v22 = vld [vmem:[%s4620_s1 + $0x150] sm:$0xff] (!%p191_p9)  ;;  %v2403_v24 = vld [vmem:[%s4620_s1 + $0x188] sm:$0xff] (!%p191_p9)  ;;  %s217_s9 = scalar_lea.vmem (!%p191_p9), [#allocation2], %s2384_s7  ;;  %s4578_s14 = scalar_lea.sflag (!%p191_p9), [#allocation3], %s215_s6 }
  0x12   : > { %v2398_v19 = vld [vmem:[%s4620_s1 + $0x160] sm:$0xff] (!%p191_p9)  ;;  %2764 = vmatpush1.bf16.msra.mxu0 (!%p191_p9), %v2763_v11  ;;  %v2400_v23 = vld [vmem:[%s4620_s1 + $0x170] sm:$0xff] (!%p191_p9)  ;;  %v2407_v26 = vld [vmem:[%s4620_s1 + $0x1a8] sm:$0xff] (!%p191_p9)  ;;  %s2318_s10 = sshll.u32 (!%p191_p9), %s217_s9, 4  ;;  %s4576_s10 = int_to_ptr.vmem [resolvable:$true] %s2318_s10 }
  0x13   : > { %2780 = vmatpush1.bf16.msra.mxu1 (!%p191_p9), %v2779_v12  ;;  %v2767_v21 = vpack.c.bf16 (!%p191_p9), %v2398_v19, %v2394_v18  ;;  %2766 = vmatprep.subr.bf16.mxu0 (!%p191_p9), %v2765_v16  ;;  %v2783_v25 = vpack.c.bf16 (!%p191_p9), %v2400_v23, %v2396_v22  ;;  %v2405_v27 = vld [vmem:[%s4620_s1 + $0x198] sm:$0xff] (!%p191_p9)  ;;  %v2769_v32 = vpack.c.bf16 (!%p191_p9), %v2407_v26, %v2403_v24  ;;  %v2402_v37 = vld [vmem:[%s4620_s1 + $0x180] sm:$0xff] (!%p191_p9)  ;;  %v2404_v42 = vld [vmem:[%s4620_s1 + $0x190] sm:$0xff] (!%p191_p9)  ;;  %s3226_s16 = scalar_lea.vmem (!%p191_p9), %s4576_s10, 256 }
  0x14   : > { %v2409_v28 = vld [vmem:[%s4620_s1 + $0x1b8] sm:$0xff] (!%p191_p9)  ;;  %2782 = vmatprep.subr.bf16.mxu1 (!%p191_p9), %v2781_v20  ;;  %v2406_v38 = vld [vmem:[%s4620_s1 + $0x1a0] sm:$0xff] (!%p191_p9)  ;;  %v2408_v43 = vld [vmem:[%s4620_s1 + $0x1b0] sm:$0xff] (!%p191_p9)  ;;  %p3227_p11 = scmp.ne.s32.totalorder (!%p191_p9), %s4576_s10, %s3226_s16 }
  0x15   : > { %s219_s15 = scalar_select %p218_p10, %s3347_s22, 1  ;;  %v2785_v33 = vpack.c.bf16 %v2409_v28, %v2405_v27  ;;  %v2771_v41 = vpack.c.bf16 %v2406_v38, %v2402_v37  ;;  %v2411_v44 = vld [vmem:[%s4620_s1 + $0x1c8] sm:$0xff]  ;;  %v2787_v46 = vpack.c.bf16 %v2408_v43, %v2404_v42  ;;  %v2413_v48 = vld [vmem:[%s4620_s1 + $0x1d8] sm:$0xff]  ;;  %v2410_v52 = vld [vmem:[%s4620_s1 + $0x1c0] sm:$0xff] }
  0x16   : > { %2768 = vmatpush1.bf16.msra.mxu0 %v2767_v21  ;;  %v2415_v47 = vld [vmem:[%s4620_s1 + $0x1e8] sm:$0xff]  ;;  %v2417_v49 = vld [vmem:[%s4620_s1 + $0x1f8] sm:$0xff]  ;;  %v2414_v53 = vld [vmem:[%s4620_s1 + $0x1e0] sm:$0xff]  ;;  %p3228_p12 = pnand %p3227_p11, %p3364_p5  ;;  %s3293_s22 = smov [#allocation2]  }
  0x17   : > { %s3177_s12 = smul.u32 24, %s219_s15  ;;  %2784 = vmatpush1.bf16.msra.mxu1 %v2783_v25  ;;  %2770 = vmatprep.subr.bf16.mxu0 %v2769_v32  ;;  %v2773_v50 = vpack.c.bf16 %v2415_v47, %v2411_v44  ;;  %v2789_v51 = vpack.c.bf16 %v2417_v49, %v2413_v48  ;;  %v2412_v54 = vld [vmem:[%s4620_s1 + $0x1d0] sm:$0xff]  ;;  %v227_v58 = vld [vmem:[%s4620_s1 + $0x8] sm:$0xff]  ;;  %v2775_v61 = vpack.c.bf16 %v2414_v53, %v2410_v52  ;;  %v229_v63 = vld [vmem:[%s4620_s1 + $0x18] sm:$0xff]  ;;  %s3230_s17 = sshll.u32 %s3293_s22, 4  ;;  %s3231_s17 = int_to_ptr.vmem [resolvable:$false] %s3230_s17 }
  0x18   : > { %2786 = vmatprep.subr.bf16.mxu1 %v2785_v33  ;;  %v2416_v57 = vld [vmem:[%s4620_s1 + $0x1f0] sm:$0xff]  ;;  %v231_v59 = vld [vmem:[%s4620_s1 + $0x28] sm:$0xff]  ;;  %v233_v0 = vld [vmem:[%s4620_s1 + $0x38] sm:$0xff]  ;;  %p3229_p13 = pneg %p3228_p12  ;;  %s3232_s23 = scalar_lea.vmem %s3231_s17, 512 }
  0x19   : > { %s222_s11 = scalar_lea.vmem %s4619_s0, %s3177_s12  ;;  %s3291_s12 = smov 124   ;;  %v2791_v62 = vpack.c.bf16 %v2416_v57, %v2412_v54  ;;  %v2793_v1 = vpack.c.bf16 %v231_v59, %v227_v58  ;;  %v2809_v2 = vpack.c.bf16 %v233_v0, %v229_v63  ;;  %v226_v3 = vld [vmem:[%s4620_s1] sm:$0xff]  ;;  %v228_v5 = vld [vmem:[%s4620_s1 + $0x10] sm:$0xff]  ;;  %v235_v7 = vld [vmem:[%s4620_s1 + $0x48] sm:$0xff] }
  0x1a   : > { %v3441_v29 = vld [vmem:[%s222_s11] sm:$0xff]  ;;  %v3443_v30 = vld [vmem:[%s222_s11 + $0x8] sm:$0xff]  ;;  %v225_v31 = vld [vmem:[%s222_s11 + $0x10] sm:$0x3]  ;;  %2772 = vmatpush1.bf16.msra.mxu0 %v2771_v41  ;;  %p3233_p0 = scmp.lt.s32.totalorder %s4576_s10, %s3231_s17  ;;  %p3234_p1 = scmp.lt.s32.totalorder %s3232_s23, %s3226_s16 }
  0x1b   : > { %855 = vrot.lane.b32.xlu0 %v3441_v29, %s3291_s12  ;;  %v295_v34 = vrot.slane %v3441_v29, 1  ;;  %v296_v35 = vrot.slane %v3443_v30, 1  ;;  %v298_v36 = vrot.slane %v225_v31, 1  ;;  %v651_v39 = vrot.slane %v3441_v29, 2  ;;  %2788 = vmatpush1.bf16.msra.mxu1 %v2787_v46  ;;  %v230_v4 = vld [vmem:[%s4620_s1 + $0x20] sm:$0xff]  ;;  %v232_v6 = vld [vmem:[%s4620_s1 + $0x30] sm:$0xff] }
  0x1c   : > { %v652_v40 = vrot.slane %v3443_v30, 2  ;;  %v654_v56 = vrot.slane %v225_v31, 2  ;;  %2774 = vmatprep.subr.bf16.mxu0 %v2773_v50  ;;  %2790 = vmatprep.subr.bf16.mxu1 %v2789_v51  ;;  %v239_v8 = vld [vmem:[%s4620_s1 + $0x68] sm:$0xff]  ;;  %v237_v11 = vld [vmem:[%s4620_s1 + $0x58] sm:$0xff]  ;;  %v2795_v13 = vpack.c.bf16 %v230_v4, %v226_v3  ;;  %v2811_v14 = vpack.c.bf16 %v232_v6, %v228_v5  ;;  %v234_v16 = vld [vmem:[%s4620_s1 + $0x40] sm:$0xff]  ;;  %p3235_p2 = por %p3234_p1, %p3233_p0 }
  0x1d   : > { %v3467_v45 = vsel %vm294_vm0, %v295_v34, %v296_v35  ;;  %v3492_v55 = vsel %vm294_vm0, %v296_v35, %v298_v36  ;;  %v241_v12 = vld [vmem:[%s4620_s1 + $0x78] sm:$0xff]  ;;  %v2797_v15 = vpack.c.bf16 %v239_v8, %v235_v7  ;;  %v238_v17 = vld [vmem:[%s4620_s1 + $0x60] sm:$0xff]  ;;  %v236_v18 = vld [vmem:[%s4620_s1 + $0x50] sm:$0xff] }
  0x1e   : > { %1058 = vrot.lane.b32.xlu1 %v3467_v45, %s3291_s12  ;;  %v3504_v60 = vsel %vm650_vm1, %v651_v39, %v652_v40  ;;  %v3535_v9 = vsel %vm650_vm1, %v652_v40, %v654_v56  ;;  %2776 = vmatpush1.bf16.msra.mxu0 %v2775_v61  ;;  %v2813_v19 = vpack.c.bf16 %v241_v12, %v237_v11  ;;  %v240_v20 = vld [vmem:[%s4620_s1 + $0x70] sm:$0xff]  ;;  %v243_v21 = vld [vmem:[%s4620_s1 + $0x88] sm:$0xff]  ;;  %v245_v23 = vld [vmem:[%s4620_s1 + $0x98] sm:$0xff]  ;;  %p3236_p3 = pnand %p3235_p2, %p3229_p13 }
  0x1f   : > { %857 = vrot.lane.b32.xlu0 %v3443_v30, %s3291_s12  ;;  %2792 = vmatpush1.bf16.msra.mxu1 %v2791_v62  ;;  %v247_v22 = vld [vmem:[%s4620_s1 + $0xa8] sm:$0xff]  ;;  %v249_v24 = vld [vmem:[%s4620_s1 + $0xb8] sm:$0xff]  ;;  %v2799_v25 = vpack.c.bf16 %v238_v17, %v234_v16  ;;  %v2815_v26 = vpack.c.bf16 %v240_v20, %v236_v18  ;;  %v242_v28 = vld [vmem:[%s4620_s1 + $0x80] sm:$0xff] }
  0x20   : > { %2794 = vmatprep.subr.bf16.mxu0 %v2793_v1  ;;  %2810 = vmatprep.subr.bf16.mxu1 %v2809_v2  ;;  %v2801_v27 = vpack.c.bf16 %v247_v22, %v243_v21  ;;  %v246_v31 = vld [vmem:[%s4620_s1 + $0xa0] sm:$0xff]  ;;  %v244_v32 = vld [vmem:[%s4620_s1 + $0x90] sm:$0xff]  ;;  %v2817_v33 = vpack.c.bf16 %v249_v24, %v245_v23  ;;  %v251_v35 = vld [vmem:[%s4620_s1 + $0xc8] sm:$0xff] }
  0x21   : > { %2418 = vmatmul.mubr.msk.f32.vlgmr.msra.gmra.mrb[0].mxu0 %vm300_vm2, %v3467_v45  ;;  %v248_v34 = vld [vmem:[%s4620_s1 + $0xb0] sm:$0xff]  ;;  %v255_v36 = vld [vmem:[%s4620_s1 + $0xe8] sm:$0xff]  ;;  %v253_v37 = vld [vmem:[%s4620_s1 + $0xd8] sm:$0xff]  ;;  %v2803_v39 = vpack.c.bf16 %v246_v31, %v242_v28 }
  0x22   : > { %1060 = vrot.lane.b32.xlu1 %v3492_v55, %s3291_s12  ;;  %2420 = vmatmul.mubr.msk.f32.vlgmr.msra.gmra.mrb[0].mxu1 %vm300_vm2, %v3467_v45  ;;  %v257_v38 = vld [vmem:[%s4620_s1 + $0xf8] sm:$0xff]  ;;  %v2819_v40 = vpack.c.bf16 %v248_v34, %v244_v32  ;;  %v2805_v41 = vpack.c.bf16 %v255_v36, %v251_v35  ;;  %v250_v42 = vld [vmem:[%s4620_s1 + $0xc0] sm:$0xff]  ;;  %v252_v44 = vld [vmem:[%s4620_s1 + $0xd0] sm:$0xff] }
  0x23   : > { %1261 = vrot.lane.b32.xlu0 %v3504_v60, %s3291_s12  ;;  %2796 = vmatpush1.bf16.msra.mxu0 %v2795_v13  ;;  %v254_v43 = vld [vmem:[%s4620_s1 + $0xe0] sm:$0xff]  ;;  %v256_v46 = vld [vmem:[%s4620_s1 + $0xf0] sm:$0xff]  ;;  %v2427_v47 = vld [vmem:[%s4620_s1 + $0x208] sm:$0xff] }
  0x24   : > { %2812 = vmatpush1.bf16.msra.mxu1 %v2811_v14  ;;  %2798 = vmatprep.subr.bf16.mxu0 %v2797_v15  ;;  %v2431_v48 = vld [vmem:[%s4620_s1 + $0x228] sm:$0xff]  ;;  %v2429_v49 = vld [vmem:[%s4620_s1 + $0x218] sm:$0xff]  ;;  %v2807_v51 = vpack.c.bf16 %v254_v43, %v250_v42  ;;  %v2823_v52 = vpack.c.bf16 %v256_v46, %v252_v44  ;;  %v2426_v54 = vld [vmem:[%s4620_s1 + $0x200] sm:$0xff] }
  0x25   : > { %2814 = vmatprep.subr.bf16.mxu1 %v2813_v19  ;;  %375 = vmatprep.mubr.f32.mxu0 %v3290_v10  ;;  %v2433_v50 = vld [vmem:[%s4620_s1 + $0x238] sm:$0xff]  ;;  %v2825_v53 = vpack.c.bf16 %v2431_v48, %v2427_v47  ;;  %v2430_v56 = vld [vmem:[%s4620_s1 + $0x220] sm:$0xff]  ;;  %v2428_v57 = vld [vmem:[%s4620_s1 + $0x210] sm:$0xff] }
  0x26   : > { %1263 = vrot.lane.b32.xlu1 %v3535_v9, %s3291_s12  ;;  %452 = vmatprep.mubr.f32.mxu1 %v3290_v10  ;;  %v2432_v58 = vld [vmem:[%s4620_s1 + $0x230] sm:$0xff]  ;;  %v2435_v59 = vld [vmem:[%s4620_s1 + $0x248] sm:$0xff]  ;;  %v2437_v62 = vld [vmem:[%s4620_s1 + $0x258] sm:$0xff]  ;;  %v2827_v0 = vpack.c.bf16 %v2430_v56, %v2426_v54 }
  0x27   : > { %1464 = vrot.lane.b32.xlu0 %v3441_v29, %s3292_s26  ;;  %2800 = vmatpush1.bf16.msra.mxu0 %v2799_v25  ;;  %v2439_v61 = vld [vmem:[%s4620_s1 + $0x268] sm:$0xff]  ;;  %v2441_v63 = vld [vmem:[%s4620_s1 + $0x278] sm:$0xff]  ;;  %v2843_v1 = vpack.c.bf16 %v2432_v58, %v2428_v57  ;;  %v2434_v3 = vld [vmem:[%s4620_s1 + $0x240] sm:$0xff] }
  0x28   : > { %2816 = vmatpush1.bf16.msra.mxu1 %v2815_v26  ;;  %2802 = vmatprep.subr.bf16.mxu0 %v2801_v27  ;;  %v2829_v2 = vpack.c.bf16 %v2439_v61, %v2435_v59  ;;  %v2438_v4 = vld [vmem:[%s4620_s1 + $0x260] sm:$0xff]  ;;  %v2436_v5 = vld [vmem:[%s4620_s1 + $0x250] sm:$0xff]  ;;  %v2845_v6 = vpack.c.bf16 %v2441_v63, %v2437_v62  ;;  %v2443_v8 = vld [vmem:[%s4620_s1 + $0x288] sm:$0xff] }
  0x29   : > { %2818 = vmatprep.subr.bf16.mxu1 %v2817_v33  ;;  %2419 = vmatmul.mubr.msk.f32.gmra.mrb[2].mxu0 %vm300_vm2, %v3492_v55  ;;  %v2440_v7 = vld [vmem:[%s4620_s1 + $0x270] sm:$0xff]  ;;  %v2447_v11 = vld [vmem:[%s4620_s1 + $0x2a8] sm:$0xff]  ;;  %v2445_v12 = vld [vmem:[%s4620_s1 + $0x298] sm:$0xff]  ;;  %v2831_v14 = vpack.c.bf16 %v2438_v4, %v2434_v3 }
  0x2a   : > { %1466 = vrot.lane.b32.xlu1 %v3443_v30, %s3292_s26  ;;  %2421 = vmatmul.mubr.msk.f32.gmra.mrb[2].mxu1 %vm300_vm2, %v3492_v55  ;;  %v2449_v13 = vld [vmem:[%s4620_s1 + $0x2b8] sm:$0xff]  ;;  %v2847_v15 = vpack.c.bf16 %v2440_v7, %v2436_v5  ;;  %v2833_v16 = vpack.c.bf16 %v2447_v11, %v2443_v8  ;;  %v2442_v17 = vld [vmem:[%s4620_s1 + $0x280] sm:$0xff]  ;;  %v2444_v19 = vld [vmem:[%s4620_s1 + $0x290] sm:$0xff] }
  0x2b   : > { %1667 = vrot.lane.b32.xlu0 %v3467_v45, %s3292_s26  ;;  %v2821_v45 = vpack.c.bf16 %v257_v38, %v253_v37  ;;  %2804 = vmatpush1.bf16.msra.mxu0 %v2803_v39  ;;  %v2446_v18 = vld [vmem:[%s4620_s1 + $0x2a0] sm:$0xff]  ;;  %v2448_v20 = vld [vmem:[%s4620_s1 + $0x2b0] sm:$0xff]  ;;  %v2451_v21 = vld [vmem:[%s4620_s1 + $0x2c8] sm:$0xff] }
  0x2c   : > { %2820 = vmatpush1.bf16.msra.mxu1 %v2819_v40  ;;  %2806 = vmatprep.subr.bf16.mxu0 %v2805_v41  ;;  %v2455_v22 = vld [vmem:[%s4620_s1 + $0x2e8] sm:$0xff]  ;;  %v2453_v23 = vld [vmem:[%s4620_s1 + $0x2d8] sm:$0xff]  ;;  %v2835_v25 = vpack.c.bf16 %v2446_v18, %v2442_v17  ;;  %v2851_v26 = vpack.c.bf16 %v2448_v20, %v2444_v19  ;;  %v2450_v28 = vld [vmem:[%s4620_s1 + $0x2c0] sm:$0xff] }
  0x2d   : > { %2822 = vmatprep.subr.bf16.mxu1 %v2821_v45  ;;  %527 = vmatprep.mubr.f32.mxu0 %v3290_v10  ;;  %v2457_v24 = vld [vmem:[%s4620_s1 + $0x2f8] sm:$0xff]  ;;  %v2837_v27 = vpack.c.bf16 %v2455_v22, %v2451_v21  ;;  %v2454_v31 = vld [vmem:[%s4620_s1 + $0x2e0] sm:$0xff]  ;;  %v2452_v32 = vld [vmem:[%s4620_s1 + $0x2d0] sm:$0xff] }
  0x2e   : > { %1669 = vrot.lane.b32.xlu1 %v3492_v55, %s3292_s26  ;;  %v2841_v55 = vpack.c.bf16 %v2433_v50, %v2429_v49  ;;  %604 = vmatprep.mubr.f32.mxu1 %v3290_v10  ;;  %v2853_v33 = vpack.c.bf16 %v2457_v24, %v2453_v23  ;;  %v2463_v34 = vld [vmem:[%s4620_s1 + $0x308] sm:$0xff]  ;;  %v2465_v36 = vld [vmem:[%s4620_s1 + $0x318] sm:$0xff]  ;;  %v2839_v38 = vpack.c.bf16 %v2454_v31, %v2450_v28  ;;  %v2462_v41 = vld [vmem:[%s4620_s1 + $0x300] sm:$0xff] }
  0x2f   : > { %1870 = vrot.lane.b32.xlu0 %v3504_v60, %s3292_s26  ;;  %2808 = vmatpush1.bf16.msra.mxu0 %v2807_v51  ;;  %v2467_v35 = vld [vmem:[%s4620_s1 + $0x328] sm:$0xff]  ;;  %v2469_v37 = vld [vmem:[%s4620_s1 + $0x338] sm:$0xff]  ;;  %v2466_v42 = vld [vmem:[%s4620_s1 + $0x320] sm:$0xff] }
  0x30   : > { %2824 = vmatpush1.bf16.msra.mxu1 %v2823_v52  ;;  %2826 = vmatprep.subr.bf16.mxu0 %v2825_v53  ;;  %v2857_v40 = vpack.c.bf16 %v2467_v35, %v2463_v34  ;;  %v2464_v43 = vld [vmem:[%s4620_s1 + $0x310] sm:$0xff]  ;;  %v2873_v44 = vpack.c.bf16 %v2469_v37, %v2465_v36  ;;  %v2471_v46 = vld [vmem:[%s4620_s1 + $0x348] sm:$0xff]  ;;  %v2473_v48 = vld [vmem:[%s4620_s1 + $0x358] sm:$0xff]  ;;  %v2859_v50 = vpack.c.bf16 %v2466_v42, %v2462_v41 }
  0x31   : > { %2842 = vmatprep.subr.bf16.mxu1 %v2841_v55  ;;  %v2468_v45 = vld [vmem:[%s4620_s1 + $0x330] sm:$0xff]  ;;  %v2475_v47 = vld [vmem:[%s4620_s1 + $0x368] sm:$0xff]  ;;  %v2477_v49 = vld [vmem:[%s4620_s1 + $0x378] sm:$0xff] }
  0x32   : > { %1872 = vrot.lane.b32.xlu1 %v3535_v9, %s3292_s26  ;;  %2422 = vmatmul.mubr.msk.f32.vlgmr.msra.gmra.mrb[0].mxu0 %vm300_vm2, %v3441_v29  ;;  %v2875_v51 = vpack.c.bf16 %v2468_v45, %v2464_v43  ;;  %v2861_v52 = vpack.c.bf16 %v2475_v47, %v2471_v46  ;;  %v2470_v53 = vld [vmem:[%s4620_s1 + $0x340] sm:$0xff]  ;;  %v2472_v56 = vld [vmem:[%s4620_s1 + $0x350] sm:$0xff]  ;;  %v2877_v57 = vpack.c.bf16 %v2477_v49, %v2473_v48  ;;  %v2479_v58 = vld [vmem:[%s4620_s1 + $0x388] sm:$0xff]  ;;  %s4574_s26 = scalar_lea.hbm %s4624_s5, %s2684_s8 }
  0x33   : > { %2424 = vmatmul.mubr.msk.f32.vlgmr.msra.gmra.mrb[0].mxu1 %vm300_vm2, %v3441_v29  ;;  %2828 = vmatpush1.bf16.msra.mxu0 %v2827_v0  ;;  %v2849_v29 = vpack.c.bf16 %v2449_v13, %v2445_v12  ;;  %v2474_v54 = vld [vmem:[%s4620_s1 + $0x360] sm:$0xff]  ;;  %v2476_v55 = vld [vmem:[%s4620_s1 + $0x370] sm:$0xff]  ;;  %v2483_v59 = vld [vmem:[%s4620_s1 + $0x3a8] sm:$0xff] }
  0x34   : > { %2844 = vmatpush1.bf16.msra.mxu1 %v2843_v1  ;;  %2830 = vmatprep.subr.bf16.mxu0 %v2829_v2  ;;  %v2481_v61 = vld [vmem:[%s4620_s1 + $0x398] sm:$0xff]  ;;  %v2863_v63 = vpack.c.bf16 %v2474_v54, %v2470_v53  ;;  %v2879_v0 = vpack.c.bf16 %v2476_v55, %v2472_v56  ;;  %v2865_v1 = vpack.c.bf16 %v2483_v59, %v2479_v58  ;;  %v2478_v2 = vld [vmem:[%s4620_s1 + $0x380] sm:$0xff]  ;;  %v2480_v4 = vld [vmem:[%s4620_s1 + $0x390] sm:$0xff] }
  0x35   : > { %2846 = vmatprep.subr.bf16.mxu1 %v2845_v6  ;;  %533 = vmatprep.mubr.f32.mxu0 %v3290_v10  ;;  %v2485_v62 = vld [vmem:[%s4620_s1 + $0x3b8] sm:$0xff]  ;;  %v2482_v3 = vld [vmem:[%s4620_s1 + $0x3a0] sm:$0xff]  ;;  %v2484_v5 = vld [vmem:[%s4620_s1 + $0x3b0] sm:$0xff] }
  0x36   : > { %610 = vmatprep.mubr.f32.mxu1 %v3290_v10  ;;  %2423 = vmatmul.mubr.msk.f32.gmra.mrb[2].mxu0 %vm300_vm2, %v3443_v30  ;;  %v2487_v6 = vld [vmem:[%s4620_s1 + $0x3c8] sm:$0xff]  ;;  %v2489_v8 = vld [vmem:[%s4620_s1 + $0x3d8] sm:$0xff]  ;;  %v2867_v12 = vpack.c.bf16 %v2482_v3, %v2478_v2  ;;  %v2883_v13 = vpack.c.bf16 %v2484_v5, %v2480_v4  ;;  %v2488_v17 = vld [vmem:[%s4620_s1 + $0x3d0] sm:$0xff] }
  0x37   : > { %2832 = vmatpush1.bf16.msra.mxu0 %v2831_v14  ;;  %2425 = vmatmul.mubr.msk.f32.gmra.mrb[2].mxu1 %vm300_vm2, %v3443_v30  ;;  %v2456_v30 = vld [vmem:[%s4620_s1 + $0x2f0] sm:$0xff]  ;;  %v2491_v7 = vld [vmem:[%s4620_s1 + $0x3e8] sm:$0xff]  ;;  %v2493_v11 = vld [vmem:[%s4620_s1 + $0x3f8] sm:$0xff] }
  0x38   : > { %2848 = vmatpush1.bf16.msra.mxu1 %v2847_v15  ;;  %2834 = vmatprep.subr.bf16.mxu0 %v2833_v16  ;;  %v2855_v39 = vpack.c.bf16 %v2456_v30, %v2452_v32  ;;  %v2869_v14 = vpack.c.bf16 %v2491_v7, %v2487_v6  ;;  %v2486_v15 = vld [vmem:[%s4620_s1 + $0x3c0] sm:$0xff]  ;;  %v2885_v18 = vpack.c.bf16 %v2493_v11, %v2489_v8  ;;  %v2499_v19 = vld [vmem:[%s4620_s1 + $0x408] sm:$0xff]  ;;  %v2501_v20 = vld [vmem:[%s4620_s1 + $0x418] sm:$0xff] }
  0x39   : > { %2850 = vmatprep.subr.bf16.mxu1 %v2849_v29  ;;  %724 = vmatprep.mubr.f32.mxu0 %v3290_v10  ;;  %v2490_v16 = vld [vmem:[%s4620_s1 + $0x3e0] sm:$0xff]  ;;  %v2503_v29 = vld [vmem:[%s4620_s1 + $0x428] sm:$0xff]  ;;  %v2505_v21 = vld [vmem:[%s4620_s1 + $0x438] sm:$0xff] }
  0x3a   : > { %801 = vmatprep.mubr.f32.mxu1 %v3290_v10  ;;  %v2871_v22 = vpack.c.bf16 %v2490_v16, %v2486_v15  ;;  %v2889_v24 = vpack.c.bf16 %v2503_v29, %v2499_v19  ;;  %v2500_v28 = vld [vmem:[%s4620_s1 + $0x410] sm:$0xff]  ;;  %v2507_v32 = vld [vmem:[%s4620_s1 + $0x448] sm:$0xff]  ;;  %v2509_v30 = vld [vmem:[%s4620_s1 + $0x458] sm:$0xff] }
  0x3b   : > { %2836 = vmatpush1.bf16.msra.mxu0 %v2835_v25  ;;  %v2905_v25 = vpack.c.bf16 %v2505_v21, %v2501_v20  ;;  %v2504_v31 = vld [vmem:[%s4620_s1 + $0x430] sm:$0xff]  ;;  %v2513_v34 = vld [vmem:[%s4620_s1 + $0x478] sm:$0xff]  ;;  %v2506_v37 = vld [vmem:[%s4620_s1 + $0x440] sm:$0xff] }
  0x3c   : > { %2852 = vmatpush1.bf16.msra.mxu1 %v2851_v26  ;;  %2838 = vmatprep.subr.bf16.mxu0 %v2837_v27  ;;  %v2498_v26 = vld [vmem:[%s4620_s1 + $0x400] sm:$0xff]  ;;  %v2907_v36 = vpack.c.bf16 %v2504_v31, %v2500_v28  ;;  %v2508_v41 = vld [vmem:[%s4620_s1 + $0x450] sm:$0xff]  ;;  %v2515_v43 = vld [vmem:[%s4620_s1 + $0x488] sm:$0xff] }
  0x3d   : > { %2854 = vmatprep.subr.bf16.mxu1 %v2853_v33  ;;  %v2502_v27 = vld [vmem:[%s4620_s1 + $0x420] sm:$0xff]  ;;  %v2511_v33 = vld [vmem:[%s4620_s1 + $0x468] sm:$0xff]  ;;  %v2512_v42 = vld [vmem:[%s4620_s1 + $0x470] sm:$0xff] }
  0x3e   : > { %v2891_v35 = vpack.c.bf16 %v2502_v27, %v2498_v26  ;;  %v2519_v45 = vld [vmem:[%s4620_s1 + $0x4a8] sm:$0xff]  ;;  %v2517_v46 = vld [vmem:[%s4620_s1 + $0x498] sm:$0xff]  ;;  %v2911_v49 = vpack.c.bf16 %v2512_v42, %v2508_v41  ;;  %v2516_v54 = vld [vmem:[%s4620_s1 + $0x490] sm:$0xff] }
  0x3f   : > { %2840 = vmatpush1.bf16.msra.mxu0 %v2839_v38  ;;  %v2510_v38 = vld [vmem:[%s4620_s1 + $0x460] sm:$0xff]  ;;  %v2521_v47 = vld [vmem:[%s4620_s1 + $0x4b8] sm:$0xff]  ;;  %v2520_v56 = vld [vmem:[%s4620_s1 + $0x4b0] sm:$0xff] }
  0x40   : > { %2856 = vmatpush1.bf16.msra.mxu1 %v2855_v39  ;;  %2858 = vmatprep.subr.bf16.mxu0 %v2857_v40  ;;  %v2893_v39 = vpack.c.bf16 %v2511_v33, %v2507_v32  ;;  %v2909_v40 = vpack.c.bf16 %v2513_v34, %v2509_v30  ;;  %v2895_v48 = vpack.c.bf16 %v2510_v38, %v2506_v37  ;;  %v2527_v58 = vld [vmem:[%s4620_s1 + $0x4e8] sm:$0xff]  ;;  %v2525_v59 = vld [vmem:[%s4620_s1 + $0x4d8] sm:$0xff]  ;;  %v2524_v4 = vld [vmem:[%s4620_s1 + $0x4d0] sm:$0xff] }
  0x41   : > { %2874 = vmatprep.subr.bf16.mxu1 %v2873_v44  ;;  %v2913_v53 = vpack.c.bf16 %v2521_v47, %v2517_v46  ;;  %v2535_v5 = vld [vmem:[%s4620_s1 + $0x508] sm:$0xff]  ;;  %v2537_v7 = vld [vmem:[%s4620_s1 + $0x518] sm:$0xff]  ;;  %v2544_v28 = vld [vmem:[%s4620_s1 + $0x550] sm:$0xff] }
  0x42   : > { %2458 = vmatmul.mubr.msk.f32.vlgmr.msra.gmra.mrb[0].mxu0 %vm300_vm2, %v3504_v60  ;;  %v2539_v6 = vld [vmem:[%s4620_s1 + $0x528] sm:$0xff]  ;;  %v2541_v8 = vld [vmem:[%s4620_s1 + $0x538] sm:$0xff]  ;;  %v2548_v31 = vld [vmem:[%s4620_s1 + $0x570] sm:$0xff] }
  0x43   : > { %2460 = vmatmul.mubr.msk.f32.vlgmr.msra.gmra.mrb[0].mxu1 %vm300_vm2, %v3504_v60  ;;  %2860 = vmatpush1.bf16.msra.mxu0 %v2859_v50  ;;  %v2881_v60 = vpack.c.bf16 %v2485_v62, %v2481_v61  ;;  %v2514_v50 = vld [vmem:[%s4620_s1 + $0x480] sm:$0xff]  ;;  %v2529_v61 = vld [vmem:[%s4620_s1 + $0x4f8] sm:$0xff]  ;;  %v2921_v15 = vpack.c.bf16 %v2539_v6, %v2535_v5  ;;  %v2937_v16 = vpack.c.bf16 %v2541_v8, %v2537_v7  ;;  %v2547_v19 = vld [vmem:[%s4620_s1 + $0x568] sm:$0xff] }
  0x44   : > { %2876 = vmatpush1.bf16.msra.mxu1 %v2875_v51  ;;  %2862 = vmatprep.subr.bf16.mxu0 %v2861_v52  ;;  %v2518_v51 = vld [vmem:[%s4620_s1 + $0x4a0] sm:$0xff]  ;;  %v2897_v52 = vpack.c.bf16 %v2519_v45, %v2515_v43  ;;  %v2917_v3 = vpack.c.bf16 %v2529_v61, %v2525_v59  ;;  %v2545_v29 = vld [vmem:[%s4620_s1 + $0x558] sm:$0xff]  ;;  %v2551_v32 = vld [vmem:[%s4620_s1 + $0x588] sm:$0xff] }
  0x45   : > { %2878 = vmatprep.subr.bf16.mxu1 %v2877_v57  ;;  %730 = vmatprep.mubr.f32.mxu0 %v3290_v10  ;;  %v2523_v57 = vld [vmem:[%s4620_s1 + $0x4c8] sm:$0xff]  ;;  %v2899_v62 = vpack.c.bf16 %v2518_v51, %v2514_v50  ;;  %v2549_v20 = vld [vmem:[%s4620_s1 + $0x578] sm:$0xff]  ;;  %v2550_v37 = vld [vmem:[%s4620_s1 + $0x580] sm:$0xff] }
  0x46   : > { %807 = vmatprep.mubr.f32.mxu1 %v3290_v10  ;;  %2459 = vmatmul.mubr.msk.f32.gmra.mrb[2].mxu0 %vm300_vm2, %v3535_v9  ;;  %v2901_v2 = vpack.c.bf16 %v2527_v58, %v2523_v57  ;;  %v2941_v27 = vpack.c.bf16 %v2549_v20, %v2545_v29  ;;  %v2555_v33 = vld [vmem:[%s4620_s1 + $0x5a8] sm:$0xff]  ;;  %v2553_v30 = vld [vmem:[%s4620_s1 + $0x598] sm:$0xff]  ;;  %v2554_v38 = vld [vmem:[%s4620_s1 + $0x5a0] sm:$0xff] }
  0x47   : > { %2864 = vmatpush1.bf16.msra.mxu0 %v2863_v63  ;;  %2461 = vmatmul.mubr.msk.f32.gmra.mrb[2].mxu1 %vm300_vm2, %v3535_v9  ;;  %v2492_v9 = vld [vmem:[%s4620_s1 + $0x3f0] sm:$0xff]  ;;  %v2915_v63 = vpack.c.bf16 %v2520_v56, %v2516_v54  ;;  %v2557_v34 = vld [vmem:[%s4620_s1 + $0x5b8] sm:$0xff]  ;;  %v2563_v45 = vld [vmem:[%s4620_s1 + $0x5e8] sm:$0xff] }
  0x48   : > { %2880 = vmatpush1.bf16.msra.mxu1 %v2879_v0  ;;  %2866 = vmatprep.subr.bf16.mxu0 %v2865_v1  ;;  %v2887_v23 = vpack.c.bf16 %v2492_v9, %v2488_v17  ;;  %v2522_v0 = vld [vmem:[%s4620_s1 + $0x4c0] sm:$0xff]  ;;  %v2536_v17 = vld [vmem:[%s4620_s1 + $0x510] sm:$0xff]  ;;  %v2543_v9 = vld [vmem:[%s4620_s1 + $0x548] sm:$0xff]  ;;  %v2945_v41 = vpack.c.bf16 %v2557_v34, %v2553_v30 }
  0x49   : > { %2882 = vmatprep.subr.bf16.mxu1 %v2881_v60  ;;  %927 = vmatprep.mubr.f32.mxu0 %v3290_v10  ;;  %v2526_v1 = vld [vmem:[%s4620_s1 + $0x4e0] sm:$0xff]  ;;  %v2528_v60 = vld [vmem:[%s4620_s1 + $0x4f0] sm:$0xff]  ;;  %v2925_v26 = vpack.c.bf16 %v2547_v19, %v2543_v9  ;;  %v2561_v46 = vld [vmem:[%s4620_s1 + $0x5d8] sm:$0xff] }
  0x4a   : > { %1004 = vmatprep.mubr.f32.mxu1 %v3290_v10  ;;  %v2903_v11 = vpack.c.bf16 %v2526_v1, %v2522_v0  ;;  %v2552_v42 = vld [vmem:[%s4620_s1 + $0x590] sm:$0xff]  ;;  %v2565_v47 = vld [vmem:[%s4620_s1 + $0x5f8] sm:$0xff]  ;;  %v2558_v50 = vld [vmem:[%s4620_s1 + $0x5c0] sm:$0xff] }
  0x4b   : > { %2868 = vmatpush1.bf16.msra.mxu0 %v2867_v12  ;;  %v2919_v12 = vpack.c.bf16 %v2528_v60, %v2524_v4  ;;  %v2556_v43 = vld [vmem:[%s4620_s1 + $0x5b0] sm:$0xff]  ;;  %v2562_v51 = vld [vmem:[%s4620_s1 + $0x5e0] sm:$0xff]  ;;  %v2571_v57 = vld [vmem:[%s4620_s1 + $0x608] sm:$0xff] }
  0x4c   : > { %2884 = vmatpush1.bf16.msra.mxu1 %v2883_v13  ;;  %2870 = vmatprep.subr.bf16.mxu0 %v2869_v14  ;;  %v2534_v13 = vld [vmem:[%s4620_s1 + $0x500] sm:$0xff]  ;;  %v2560_v54 = vld [vmem:[%s4620_s1 + $0x5d0] sm:$0xff]  ;;  %v2573_v58 = vld [vmem:[%s4620_s1 + $0x618] sm:$0xff]  ;;  %v2935_v61 = vpack.c.bf16 %v2562_v51, %v2558_v50 }
  0x4d   : > { %2886 = vmatprep.subr.bf16.mxu1 %v2885_v18  ;;  %v2538_v14 = vld [vmem:[%s4620_s1 + $0x520] sm:$0xff]  ;;  %v2540_v18 = vld [vmem:[%s4620_s1 + $0x530] sm:$0xff]  ;;  %v2577_v59 = vld [vmem:[%s4620_s1 + $0x638] sm:$0xff] }
  0x4e   : > { %v2564_v56 = vld [vmem:[%s4620_s1 + $0x5f0] sm:$0xff]  ;;  %v2574_v0 = vld [vmem:[%s4620_s1 + $0x620] sm:$0xff]  ;;  %v2579_v60 = vld [vmem:[%s4620_s1 + $0x648] sm:$0xff] }
  0x4f   : > { %2872 = vmatpush1.bf16.msra.mxu0 %v2871_v22  ;;  %v2923_v22 = vpack.c.bf16 %v2538_v14, %v2534_v13  ;;  %v2576_v4 = vld [vmem:[%s4620_s1 + $0x630] sm:$0xff]  ;;  %v2583_v5 = vld [vmem:[%s4620_s1 + $0x668] sm:$0xff]  ;;  %v2581_v6 = vld [vmem:[%s4620_s1 + $0x658] sm:$0xff] }
  0x50   : > { %2888 = vmatpush1.bf16.msra.mxu1 %v2887_v23  ;;  %2890 = vmatprep.subr.bf16.mxu0 %v2889_v24  ;;  %v2939_v23 = vpack.c.bf16 %v2540_v18, %v2536_v17  ;;  %v2542_v24 = vld [vmem:[%s4620_s1 + $0x540] sm:$0xff]  ;;  %v2585_v7 = vld [vmem:[%s4620_s1 + $0x678] sm:$0xff]  ;;  %v2580_v17 = vld [vmem:[%s4620_s1 + $0x650] sm:$0xff] }
  0x51   : > { %2906 = vmatprep.subr.bf16.mxu1 %v2905_v25  ;;  %v2546_v25 = vld [vmem:[%s4620_s1 + $0x560] sm:$0xff]  ;;  %v2584_v18 = vld [vmem:[%s4620_s1 + $0x670] sm:$0xff]  ;;  %v2587_v9 = vld [vmem:[%s4620_s1 + $0x688] sm:$0xff] }
  0x52   : > { %v2578_v13 = vld [vmem:[%s4620_s1 + $0x640] sm:$0xff]  ;;  %v2591_v19 = vld [vmem:[%s4620_s1 + $0x6a8] sm:$0xff]  ;;  %v2589_v29 = vld [vmem:[%s4620_s1 + $0x698] sm:$0xff] }
  0x53   : > { %v2582_v14 = vld [vmem:[%s4620_s1 + $0x660] sm:$0xff]  ;;  %v2593_v20 = vld [vmem:[%s4620_s1 + $0x6b8] sm:$0xff] }
  0x54   : > { %v2597_v30 = vld [vmem:[%s4620_s1 + $0x6d8] sm:$0xff]  ;;  %v2610_v50 = vld [vmem:[%s4620_s1 + $0x720] sm:$0xff] }
  0x55   : > { %v2601_v34 = vld [vmem:[%s4620_s1 + $0x6f8] sm:$0xff] }
  0x8d   : > { %v856_v44 = vpop.permute.xlu0 %855 }
  0x8e   : > { %2494 = vmatmul.mubr.msk.f32.vlgmr.msra.gmra.mrb[0].mxu0 %vm300_vm2, %v856_v44  ;;  %2496 = vmatmul.mubr.msk.f32.vlgmr.msra.gmra.mrb[0].mxu1 %vm300_vm2, %v856_v44  ;;  %v2559_v44 = vld [vmem:[%s4620_s1 + $0x5c8] sm:$0xff] }
  0x8f   : > { %2892 = vmatpush1.bf16.msra.mxu0 %v2891_v35  ;;  %2908 = vmatpush1.bf16.msra.mxu1 %v2907_v36  ;;  %v2927_v35 = vpack.c.bf16 %v2546_v25, %v2542_v24  ;;  %v2943_v36 = vpack.c.bf16 %v2548_v31, %v2544_v28  ;;  %v2590_v24 = vld [vmem:[%s4620_s1 + $0x6a0] sm:$0xff]  ;;  %v2588_v28 = vld [vmem:[%s4620_s1 + $0x690] sm:$0xff] }
  0x90   : > { %2894 = vmatprep.subr.bf16.mxu0 %v2893_v39  ;;  %2910 = vmatprep.subr.bf16.mxu1 %v2909_v40  ;;  %v1059_v21 = vpop.permute.xlu1 %1058  ;;  %v2929_v40 = vpack.c.bf16 %v2555_v33, %v2551_v32  ;;  %v2592_v31 = vld [vmem:[%s4620_s1 + $0x6b0] sm:$0xff]  ;;  %v2595_v32 = vld [vmem:[%s4620_s1 + $0x6c8] sm:$0xff] }
  0x91   : > { %v858_v55 = vpop.permute.xlu0 %857  ;;  %933 = vmatprep.mubr.f32.mxu0 %v3290_v10  ;;  %1010 = vmatprep.mubr.f32.mxu1 %v3290_v10  ;;  %v2599_v33 = vld [vmem:[%s4620_s1 + $0x6e8] sm:$0xff] }
  0x92   : > { %2495 = vmatmul.mubr.msk.f32.gmra.mrb[2].mxu0 %vm300_vm2, %v858_v55  ;;  %2497 = vmatmul.mubr.msk.f32.gmra.mrb[2].mxu1 %vm300_vm2, %v858_v55  ;;  %v2575_v55 = vld [vmem:[%s4620_s1 + $0x628] sm:$0xff] }
  0x93   : > { %2896 = vmatpush1.bf16.msra.mxu0 %v2895_v48  ;;  %2912 = vmatpush1.bf16.msra.mxu1 %v2911_v49  ;;  %v2931_v48 = vpack.c.bf16 %v2554_v38, %v2550_v37  ;;  %v2947_v49 = vpack.c.bf16 %v2556_v43, %v2552_v42  ;;  %v2953_v1 = vpack.c.bf16 %v2575_v55, %v2571_v57  ;;  %v2594_v37 = vld [vmem:[%s4620_s1 + $0x6c0] sm:$0xff]  ;;  %v2600_v42 = vld [vmem:[%s4620_s1 + $0x6f0] sm:$0xff]  ;;  %v2607_v43 = vld [vmem:[%s4620_s1 + $0x708] sm:$0xff] }
  0x94   : > { %2898 = vmatprep.subr.bf16.mxu0 %v2897_v52  ;;  %2914 = vmatprep.subr.bf16.mxu1 %v2913_v53  ;;  %v1061_v39 = vpop.permute.xlu1 %1060  ;;  %v2933_v52 = vpack.c.bf16 %v2563_v45, %v2559_v44  ;;  %v2949_v53 = vpack.c.bf16 %v2565_v47, %v2561_v46  ;;  %v2598_v38 = vld [vmem:[%s4620_s1 + $0x6e0] sm:$0xff]  ;;  %v2611_v44 = vld [vmem:[%s4620_s1 + $0x728] sm:$0xff]  ;;  %v2609_v45 = vld [vmem:[%s4620_s1 + $0x718] sm:$0xff] }
  0x95   : > { %1130 = vmatprep.mubr.f32.mxu0 %v3290_v10  ;;  %1207 = vmatprep.mubr.f32.mxu1 %v3290_v10  ;;  %v1262_v8 = vpop.permute.xlu0 %1261  ;;  %v2613_v46 = vld [vmem:[%s4620_s1 + $0x738] sm:$0xff]  ;;  %v2967_v47 = vpack.c.bf16 %v2598_v38, %v2594_v37  ;;  %v2985_v51 = vpack.c.bf16 %v2611_v44, %v2607_v43  ;;  %v2619_v57 = vld [vmem:[%s4620_s1 + $0x768] sm:$0xff]  ;;  %v2646_v37 = vld [vmem:[%s4620_s1 + $0x820] sm:$0xff] }
  0x96   : > { %v2617_v55 = vld [vmem:[%s4620_s1 + $0x758] sm:$0xff]  ;;  %v2655_v43 = vld [vmem:[%s4620_s1 + $0x868] sm:$0xff] }
  0x97   : > { %2900 = vmatpush1.bf16.msra.mxu0 %v2899_v62  ;;  %2916 = vmatpush1.bf16.msra.mxu1 %v2915_v63  ;;  %v2951_v62 = vpack.c.bf16 %v2564_v56, %v2560_v54  ;;  %v2570_v63 = vld [vmem:[%s4620_s1 + $0x600] sm:$0xff]  ;;  %v2612_v54 = vld [vmem:[%s4620_s1 + $0x730] sm:$0xff]  ;;  %v2615_v56 = vld [vmem:[%s4620_s1 + $0x748] sm:$0xff] }
  0x98   : > { %2902 = vmatprep.subr.bf16.mxu0 %v2901_v2  ;;  %2918 = vmatprep.subr.bf16.mxu1 %v2917_v3  ;;  %v2969_v2 = vpack.c.bf16 %v2577_v59, %v2573_v58  ;;  %v2572_v3 = vld [vmem:[%s4620_s1 + $0x610] sm:$0xff]  ;;  %v1264_v25 = vpop.permute.xlu1 %1263  ;;  %v2621_v58 = vld [vmem:[%s4620_s1 + $0x778] sm:$0xff] }
  0x99   : > { %v1465_v59 = vpop.permute.xlu0 %1464  ;;  %v2653_v44 = vld [vmem:[%s4620_s1 + $0x858] sm:$0xff] }
  0x9b   : > { %2904 = vmatpush1.bf16.msra.mxu0 %v2903_v11  ;;  %2920 = vmatpush1.bf16.msra.mxu1 %v2919_v12  ;;  %v2955_v11 = vpack.c.bf16 %v2574_v0, %v2570_v63  ;;  %v2971_v12 = vpack.c.bf16 %v2576_v4, %v2572_v3  ;;  %v2614_v63 = vld [vmem:[%s4620_s1 + $0x740] sm:$0xff]  ;;  %v2616_v3 = vld [vmem:[%s4620_s1 + $0x750] sm:$0xff] }
  0x9c   : > { %2922 = vmatprep.subr.bf16.mxu0 %v2921_v15  ;;  %2938 = vmatprep.subr.bf16.mxu1 %v2937_v16  ;;  %v2957_v15 = vpack.c.bf16 %v2583_v5, %v2579_v60  ;;  %v2973_v16 = vpack.c.bf16 %v2585_v7, %v2581_v6  ;;  %v2618_v0 = vld [vmem:[%s4620_s1 + $0x760] sm:$0xff]  ;;  %v2620_v4 = vld [vmem:[%s4620_s1 + $0x770] sm:$0xff]  ;;  %v2623_v60 = vld [vmem:[%s4620_s1 + $0x788] sm:$0xff] }
  0x9d   : > { %v2627_v5 = vld [vmem:[%s4620_s1 + $0x7a8] sm:$0xff]  ;;  %v2625_v6 = vld [vmem:[%s4620_s1 + $0x798] sm:$0xff] }
  0x9e   : > { %2530 = vmatmul.mubr.msk.f32.vlgmr.msra.gmra.mrb[0].mxu0 %vm300_vm2, %v1059_v21  ;;  %2532 = vmatmul.mubr.msk.f32.vlgmr.msra.gmra.mrb[0].mxu1 %vm300_vm2, %v1059_v21  ;;  %v2959_v21 = vpack.c.bf16 %v2582_v14, %v2578_v13  ;;  %v2629_v7 = vld [vmem:[%s4620_s1 + $0x7b8] sm:$0xff]  ;;  %v2626_v13 = vld [vmem:[%s4620_s1 + $0x7a0] sm:$0xff]  ;;  %v1467_v14 = vpop.permute.xlu1 %1466 }
  0x9f   : > { %2924 = vmatpush1.bf16.msra.mxu0 %v2923_v22  ;;  %2940 = vmatpush1.bf16.msra.mxu1 %v2939_v23  ;;  %v2975_v22 = vpack.c.bf16 %v2584_v18, %v2580_v17  ;;  %v2586_v23 = vld [vmem:[%s4620_s1 + $0x680] sm:$0xff]  ;;  %v2624_v17 = vld [vmem:[%s4620_s1 + $0x790] sm:$0xff] }
  0xa0   : > { %2926 = vmatprep.subr.bf16.mxu0 %v2925_v26  ;;  %2942 = vmatprep.subr.bf16.mxu1 %v2941_v27  ;;  %v2961_v26 = vpack.c.bf16 %v2591_v19, %v2587_v9  ;;  %v2977_v27 = vpack.c.bf16 %v2593_v20, %v2589_v29  ;;  %v2628_v18 = vld [vmem:[%s4620_s1 + $0x7b0] sm:$0xff]  ;;  %v2631_v9 = vld [vmem:[%s4620_s1 + $0x7c8] sm:$0xff]  ;;  %v2633_v29 = vld [vmem:[%s4620_s1 + $0x7d8] sm:$0xff] }
  0xa1   : > { %1136 = vmatprep.mubr.f32.mxu0 %v3290_v10  ;;  %1213 = vmatprep.mubr.f32.mxu1 %v3290_v10  ;;  %v2635_v19 = vld [vmem:[%s4620_s1 + $0x7e8] sm:$0xff]  ;;  %v2637_v20 = vld [vmem:[%s4620_s1 + $0x7f8] sm:$0xff] }
  0xa2   : > { %2531 = vmatmul.mubr.msk.f32.gmra.mrb[2].mxu0 %vm300_vm2, %v1061_v39  ;;  %2533 = vmatmul.mubr.msk.f32.gmra.mrb[2].mxu1 %vm300_vm2, %v1061_v39  ;;  %v2965_v39 = vpack.c.bf16 %v2599_v33, %v2595_v32  ;;  %v2647_v32 = vld [vmem:[%s4620_s1 + $0x828] sm:$0xff]  ;;  %v2645_v33 = vld [vmem:[%s4620_s1 + $0x818] sm:$0xff] }
  0xa3   : > { %2928 = vmatpush1.bf16.msra.mxu0 %v2927_v35  ;;  %2944 = vmatpush1.bf16.msra.mxu1 %v2943_v36  ;;  %v2963_v35 = vpack.c.bf16 %v2590_v24, %v2586_v23  ;;  %v2979_v36 = vpack.c.bf16 %v2592_v31, %v2588_v28  ;;  %v2630_v23 = vld [vmem:[%s4620_s1 + $0x7c0] sm:$0xff]  ;;  %v2636_v28 = vld [vmem:[%s4620_s1 + $0x7f0] sm:$0xff]  ;;  %v2643_v31 = vld [vmem:[%s4620_s1 + $0x808] sm:$0xff] }
  0xa4   : > { %2930 = vmatprep.subr.bf16.mxu0 %v2929_v40  ;;  %2946 = vmatprep.subr.bf16.mxu1 %v2945_v41  ;;  %v2981_v40 = vpack.c.bf16 %v2601_v34, %v2597_v30  ;;  %v2596_v41 = vld [vmem:[%s4620_s1 + $0x6d0] sm:$0xff]  ;;  %v2634_v24 = vld [vmem:[%s4620_s1 + $0x7e0] sm:$0xff]  ;;  %v2649_v30 = vld [vmem:[%s4620_s1 + $0x838] sm:$0xff]  ;;  %v3017_v38 = vpack.c.bf16 %v2647_v32, %v2643_v31 }
  0xa5   : > { %1333 = vmatprep.mubr.f32.mxu0 %v3290_v10  ;;  %1410 = vmatprep.mubr.f32.mxu1 %v3290_v10  ;;  %v2999_v34 = vpack.c.bf16 %v2634_v24, %v2630_v23  ;;  %v2078_v24 = vld [vmem:[%s4622_s3] sm:$0xff]  ;;  %v2097_v31 = vld [vmem:[%s4622_s3 + $0x98] sm:$0xff]  ;;  %v2128_v32 = vld [vmem:[%s4622_s3 + $0x190] sm:$0xff] }
  0xa7   : > { %2932 = vmatpush1.bf16.msra.mxu0 %v2931_v48  ;;  %2948 = vmatpush1.bf16.msra.mxu1 %v2947_v49  ;;  %v2983_v48 = vpack.c.bf16 %v2600_v42, %v2596_v41  ;;  %v2606_v49 = vld [vmem:[%s4620_s1 + $0x700] sm:$0xff]  ;;  %v2648_v41 = vld [vmem:[%s4620_s1 + $0x830] sm:$0xff]  ;;  %v2651_v42 = vld [vmem:[%s4620_s1 + $0x848] sm:$0xff] }
  0xa8   : > { %2934 = vmatprep.subr.bf16.mxu0 %v2933_v52  ;;  %2950 = vmatprep.subr.bf16.mxu1 %v2949_v53  ;;  %v3001_v52 = vpack.c.bf16 %v2613_v46, %v2609_v45  ;;  %v2608_v53 = vld [vmem:[%s4620_s1 + $0x710] sm:$0xff]  ;;  %v2657_v45 = vld [vmem:[%s4620_s1 + $0x878] sm:$0xff]  ;;  %v1668_v46 = vpop.permute.xlu0 %1667 }
  0xab   : > { %2936 = vmatpush1.bf16.msra.mxu0 %v2935_v61  ;;  %2952 = vmatpush1.bf16.msra.mxu1 %v2951_v62  ;;  %v2987_v61 = vpack.c.bf16 %v2610_v50, %v2606_v49  ;;  %v3003_v62 = vpack.c.bf16 %v2612_v54, %v2608_v53  ;;  %v2650_v49 = vld [vmem:[%s4620_s1 + $0x840] sm:$0xff]  ;;  %v2652_v53 = vld [vmem:[%s4620_s1 + $0x850] sm:$0xff] }
  0xac   : > { %2954 = vmatprep.subr.bf16.mxu0 %v2953_v1  ;;  %2970 = vmatprep.subr.bf16.mxu1 %v2969_v2  ;;  %v2989_v1 = vpack.c.bf16 %v2619_v57, %v2615_v56  ;;  %v3005_v2 = vpack.c.bf16 %v2621_v58, %v2617_v55  ;;  %v2654_v50 = vld [vmem:[%s4620_s1 + $0x860] sm:$0xff]  ;;  %v2656_v54 = vld [vmem:[%s4620_s1 + $0x870] sm:$0xff]  ;;  %v2659_v56 = vld [vmem:[%s4620_s1 + $0x888] sm:$0xff] }
  0xad   : > { %v2663_v57 = vld [vmem:[%s4620_s1 + $0x8a8] sm:$0xff]  ;;  %v2661_v55 = vld [vmem:[%s4620_s1 + $0x898] sm:$0xff] }
  0xae   : > { %2566 = vmatmul.mubr.msk.f32.vlgmr.msra.gmra.mrb[0].mxu0 %vm300_vm2, %v1262_v8  ;;  %2568 = vmatmul.mubr.msk.f32.vlgmr.msra.gmra.mrb[0].mxu1 %vm300_vm2, %v1262_v8  ;;  %v2991_v8 = vpack.c.bf16 %v2618_v0, %v2614_v63  ;;  %v2665_v58 = vld [vmem:[%s4620_s1 + $0x8b8] sm:$0xff]  ;;  %v2662_v63 = vld [vmem:[%s4620_s1 + $0x8a0] sm:$0xff]  ;;  %v1670_v0 = vpop.permute.xlu1 %1669 }
  0xaf   : > { %2956 = vmatpush1.bf16.msra.mxu0 %v2955_v11  ;;  %2972 = vmatpush1.bf16.msra.mxu1 %v2971_v12  ;;  %v3007_v11 = vpack.c.bf16 %v2620_v4, %v2616_v3  ;;  %v2622_v12 = vld [vmem:[%s4620_s1 + $0x780] sm:$0xff]  ;;  %v2660_v3 = vld [vmem:[%s4620_s1 + $0x890] sm:$0xff] }
  0xb0   : > { %2958 = vmatprep.subr.bf16.mxu0 %v2957_v15  ;;  %2974 = vmatprep.subr.bf16.mxu1 %v2973_v16  ;;  %v2993_v15 = vpack.c.bf16 %v2627_v5, %v2623_v60  ;;  %v3009_v16 = vpack.c.bf16 %v2629_v7, %v2625_v6  ;;  %v2664_v4 = vld [vmem:[%s4620_s1 + $0x8b0] sm:$0xff]  ;;  %v2667_v60 = vld [vmem:[%s4620_s1 + $0x8c8] sm:$0xff]  ;;  %v2669_v6 = vld [vmem:[%s4620_s1 + $0x8d8] sm:$0xff] }
  0xb1   : > { %1339 = vmatprep.mubr.f32.mxu0 %v3290_v10  ;;  %1416 = vmatprep.mubr.f32.mxu1 %v3290_v10  ;;  %v2671_v5 = vld [vmem:[%s4620_s1 + $0x8e8] sm:$0xff]  ;;  %v2673_v7 = vld [vmem:[%s4620_s1 + $0x8f8] sm:$0xff] }
  0xb2   : > { %2567 = vmatmul.mubr.msk.f32.gmra.mrb[2].mxu0 %vm300_vm2, %v1264_v25  ;;  %2569 = vmatmul.mubr.msk.f32.gmra.mrb[2].mxu1 %vm300_vm2, %v1264_v25  ;;  %v2997_v25 = vpack.c.bf16 %v2635_v19, %v2631_v9  ;;  %v2095_v9 = vld [vmem:[%s4622_s3 + $0x88] sm:$0xff]  ;;  %v2126_v19 = vld [vmem:[%s4622_s3 + $0x180] sm:$0xff] }
  0xb3   : > { %2960 = vmatpush1.bf16.msra.mxu0 %v2959_v21  ;;  %2976 = vmatpush1.bf16.msra.mxu1 %v2975_v22  ;;  %v2995_v21 = vpack.c.bf16 %v2626_v13, %v2622_v12  ;;  %v3011_v22 = vpack.c.bf16 %v2628_v18, %v2624_v17  ;;  %v2666_v12 = vld [vmem:[%s4620_s1 + $0x8c0] sm:$0xff]  ;;  %v2672_v17 = vld [vmem:[%s4620_s1 + $0x8f0] sm:$0xff] }
  0xb4   : > { %2962 = vmatprep.subr.bf16.mxu0 %v2961_v26  ;;  %2978 = vmatprep.subr.bf16.mxu1 %v2977_v27  ;;  %v3013_v26 = vpack.c.bf16 %v2637_v20, %v2633_v29  ;;  %v2632_v27 = vld [vmem:[%s4620_s1 + $0x7d0] sm:$0xff]  ;;  %v2670_v13 = vld [vmem:[%s4620_s1 + $0x8e0] sm:$0xff]  ;;  %v2127_v29 = vld [vmem:[%s4622_s3 + $0x188] sm:$0xff] }
  0xb5   : > { %1536 = vmatprep.mubr.f32.mxu0 %v3290_v10  ;;  %1613 = vmatprep.mubr.f32.mxu1 %v3290_v10  ;;  %v2094_v18 = vld [vmem:[%s4622_s3 + $0x80] sm:$0xff]  ;;  %v3031_v20 = vpack.c.bf16 %v2670_v13, %v2666_v12  ;;  %v3081_v23 = vpack.c.bf16 %v2127_v29, %v2126_v19 }
  0xb7   : > { %2964 = vmatpush1.bf16.msra.mxu0 %v2963_v35  ;;  %2980 = vmatpush1.bf16.msra.mxu1 %v2979_v36  ;;  %v3015_v35 = vpack.c.bf16 %v2636_v28, %v2632_v27  ;;  %v2642_v36 = vld [vmem:[%s4620_s1 + $0x800] sm:$0xff]  ;;  %v2111_v27 = vld [vmem:[%s4622_s3 + $0x108] sm:$0xff]  ;;  %v2096_v28 = vld [vmem:[%s4622_s3 + $0x90] sm:$0xff] }
  0xb8   : > { %2966 = vmatprep.subr.bf16.mxu0 %v2965_v39  ;;  %2982 = vmatprep.subr.bf16.mxu1 %v2981_v40  ;;  %v3033_v39 = vpack.c.bf16 %v2649_v30, %v2645_v33  ;;  %v2644_v40 = vld [vmem:[%s4620_s1 + $0x810] sm:$0xff]  ;;  %v2129_v33 = vld [vmem:[%s4622_s3 + $0x198] sm:$0xff]  ;;  %v1871_v30 = vpop.permute.xlu0 %1870 }
  0xbb   : > { %2968 = vmatpush1.bf16.msra.mxu0 %v2967_v47  ;;  %2984 = vmatpush1.bf16.msra.mxu1 %v2983_v48  ;;  %v3019_v47 = vpack.c.bf16 %v2646_v37, %v2642_v36  ;;  %v3035_v48 = vpack.c.bf16 %v2648_v41, %v2644_v40  ;;  %v2080_v36 = vld [vmem:[%s4622_s3 + $0x10] sm:$0xff]  ;;  %v2081_v37 = vld [vmem:[%s4622_s3 + $0x18] sm:$0xff] }
  0xbc   : > { %2986 = vmatprep.subr.bf16.mxu0 %v2985_v51  ;;  %3002 = vmatprep.subr.bf16.mxu1 %v3001_v52  ;;  %v3021_v51 = vpack.c.bf16 %v2655_v43, %v2651_v42  ;;  %v3037_v52 = vpack.c.bf16 %v2657_v45, %v2653_v44  ;;  %v2112_v40 = vld [vmem:[%s4622_s3 + $0x110] sm:$0xff]  ;;  %v2113_v41 = vld [vmem:[%s4622_s3 + $0x118] sm:$0xff]  ;;  %v2098_v42 = vld [vmem:[%s4622_s3 + $0xa0] sm:$0xff] }
  0xbd   : > { %v2099_v43 = vld [vmem:[%s4622_s3 + $0xa8] sm:$0xff]  ;;  %v2130_v44 = vld [vmem:[%s4622_s3 + $0x1a0] sm:$0xff] }
  0xbe   : > { %2602 = vmatmul.mubr.msk.f32.vlgmr.msra.gmra.mrb[0].mxu0 %vm300_vm2, %v1465_v59  ;;  %2604 = vmatmul.mubr.msk.f32.vlgmr.msra.gmra.mrb[0].mxu1 %vm300_vm2, %v1465_v59  ;;  %v3023_v59 = vpack.c.bf16 %v2654_v50, %v2650_v49  ;;  %v2131_v45 = vld [vmem:[%s4622_s3 + $0x1a8] sm:$0xff]  ;;  %v2082_v49 = vld [vmem:[%s4622_s3 + $0x20] sm:$0xff] }
  0xbf   : > { %2988 = vmatpush1.bf16.msra.mxu0 %v2987_v61  ;;  %3004 = vmatpush1.bf16.msra.mxu1 %v3003_v62  ;;  %v3039_v61 = vpack.c.bf16 %v2656_v54, %v2652_v53  ;;  %v2658_v62 = vld [vmem:[%s4620_s1 + $0x880] sm:$0xff]  ;;  %v2083_v50 = vld [vmem:[%s4622_s3 + $0x28] sm:$0xff]  ;;  %v2100_v54 = vld [vmem:[%s4622_s3 + $0xb0] sm:$0xff] }
  0xc0   : > { %2990 = vmatprep.subr.bf16.mxu0 %v2989_v1  ;;  %3006 = vmatprep.subr.bf16.mxu1 %v3005_v2  ;;  %v3025_v1 = vpack.c.bf16 %v2663_v57, %v2659_v56  ;;  %v3041_v2 = vpack.c.bf16 %v2665_v58, %v2661_v55  ;;  %v2115_v53 = vld [vmem:[%s4622_s3 + $0x128] sm:$0xff]  ;;  %v2101_v56 = vld [vmem:[%s4622_s3 + $0xb8] sm:$0xff]  ;;  %v2132_v57 = vld [vmem:[%s4622_s3 + $0x1b0] sm:$0xff]  ;;  %v3059_v58 = vpack.c.bf16 %v2083_v50, %v2082_v49 }
  0xc1   : > { %1542 = vmatprep.mubr.f32.mxu0 %v3290_v10  ;;  %1619 = vmatprep.mubr.f32.mxu1 %v3290_v10  ;;  %v2133_v55 = vld [vmem:[%s4622_s3 + $0x1b8] sm:$0xff]  ;;  %v2124_v50 = vld [vmem:[%s4622_s3 + $0x170] sm:$0xff] }
  0xc2   : > { %2603 = vmatmul.mubr.msk.f32.gmra.mrb[2].mxu0 %vm300_vm2, %v1467_v14  ;;  %2605 = vmatmul.mubr.msk.f32.gmra.mrb[2].mxu1 %vm300_vm2, %v1467_v14  ;;  %v3029_v14 = vpack.c.bf16 %v2671_v5, %v2667_v60  ;;  %v2134_v60 = vld [vmem:[%s4622_s3 + $0x1c0] sm:$0xff]  ;;  %v2135_v5 = vld [vmem:[%s4622_s3 + $0x1c8] sm:$0xff] }
  0xc3   : > { %2992 = vmatpush1.bf16.msra.mxu0 %v2991_v8  ;;  %3008 = vmatpush1.bf16.msra.mxu1 %v3007_v11  ;;  %v3027_v8 = vpack.c.bf16 %v2662_v63, %v2658_v62  ;;  %v3043_v11 = vpack.c.bf16 %v2664_v4, %v2660_v3  ;;  %v2085_v62 = vld [vmem:[%s4622_s3 + $0x38] sm:$0xff]  ;;  %v3061_v63 = vpack.c.bf16 %v2101_v56, %v2100_v54  ;;  %v2102_v3 = vld [vmem:[%s4622_s3 + $0xc0] sm:$0xff]  ;;  %v2103_v4 = vld [vmem:[%s4622_s3 + $0xc8] sm:$0xff] }
  0xc4   : > { %2994 = vmatprep.subr.bf16.mxu0 %v2993_v15  ;;  %3010 = vmatprep.subr.bf16.mxu1 %v3009_v16  ;;  %v3045_v15 = vpack.c.bf16 %v2673_v7, %v2669_v6  ;;  %v2668_v16 = vld [vmem:[%s4620_s1 + $0x8d0] sm:$0xff]  ;;  %v3065_v12 = vpack.c.bf16 %v2103_v4, %v2102_v3  ;;  %v3097_v13 = vpack.c.bf16 %v2135_v5, %v2134_v60 }
  0xc5   : > { %1739 = vmatprep.mubr.f32.mxu0 %v3290_v10  ;;  %1816 = vmatprep.mubr.f32.mxu1 %v3290_v10 }
  0xc7   : > { %2996 = vmatpush1.bf16.msra.mxu0 %v2995_v21  ;;  %3012 = vmatpush1.bf16.msra.mxu1 %v3011_v22  ;;  %v3047_v21 = vpack.c.bf16 %v2672_v17, %v2668_v16  ;;  %v3049_v22 = vpack.c.bf16 %v2095_v9, %v2094_v18  ;;  %v2104_v16 = vld [vmem:[%s4622_s3 + $0xd0] sm:$0xff]  ;;  %v2105_v17 = vld [vmem:[%s4622_s3 + $0xd8] sm:$0xff] }
  0xc8   : > { %2998 = vmatprep.subr.bf16.mxu0 %v2997_v25  ;;  %3014 = vmatprep.subr.bf16.mxu1 %v3013_v26  ;;  %v2079_v25 = vld [vmem:[%s4622_s3 + $0x8] sm:$0xff]  ;;  %v2110_v26 = vld [vmem:[%s4622_s3 + $0x100] sm:$0xff]  ;;  %v2136_v18 = vld [vmem:[%s4622_s3 + $0x1d0] sm:$0xff] }
  0xc9   : > { %v2137_v9 = vld [vmem:[%s4622_s3 + $0x1d8] sm:$0xff] }
  0xcb   : > { %3000 = vmatpush1.bf16.msra.mxu0 %v2999_v34  ;;  %3016 = vmatpush1.bf16.msra.mxu1 %v3015_v35  ;;  %v3051_v34 = vpack.c.bf16 %v2079_v25, %v2078_v24  ;;  %v3083_v35 = vpack.c.bf16 %v2111_v27, %v2110_v26  ;;  %v2120_v24 = vld [vmem:[%s4622_s3 + $0x150] sm:$0xff]  ;;  %v2121_v25 = vld [vmem:[%s4622_s3 + $0x158] sm:$0xff]  ;;  %v2106_v26 = vld [vmem:[%s4622_s3 + $0xe0] sm:$0xff] }
  0xcc   : > { %3018 = vmatprep.subr.bf16.mxu0 %v3017_v38  ;;  %3034 = vmatprep.subr.bf16.mxu1 %v3033_v39  ;;  %v3053_v38 = vpack.c.bf16 %v2097_v31, %v2096_v28  ;;  %v3085_v39 = vpack.c.bf16 %v2129_v33, %v2128_v32  ;;  %v2107_v27 = vld [vmem:[%s4622_s3 + $0xe8] sm:$0xff]  ;;  %v2138_v28 = vld [vmem:[%s4622_s3 + $0x1e0] sm:$0xff]  ;;  %v3103_v33 = vpack.c.bf16 %v2121_v25, %v2120_v24 }
  0xcd   : > { %v2139_v31 = vld [vmem:[%s4622_s3 + $0x1e8] sm:$0xff]  ;;  %v2678_v25 = vld [vmem:[%s4623_s4] ss:$0 sm:$0xff] }
  0xce   : > { %2638 = vmatmul.mubr.msk.f32.vlgmr.msra.gmra.mrb[0].mxu0 %vm300_vm2, %v1668_v46  ;;  %2640 = vmatmul.mubr.msk.f32.vlgmr.msra.gmra.mrb[0].mxu1 %vm300_vm2, %v1668_v46  ;;  %v1873_v46 = vpop.permute.xlu1 %1872 }
  0xcf   : > { %3020 = vmatpush1.bf16.msra.mxu0 %v3019_v47  ;;  %3036 = vmatpush1.bf16.msra.mxu1 %v3035_v48  ;;  %v3055_v47 = vpack.c.bf16 %v2081_v37, %v2080_v36  ;;  %v3087_v48 = vpack.c.bf16 %v2113_v41, %v2112_v40  ;;  %v2091_v36 = vld [vmem:[%s4622_s3 + $0x68] sm:$0xff]  ;;  %v2122_v37 = vld [vmem:[%s4622_s3 + $0x160] sm:$0xff]  ;;  %v2108_v41 = vld [vmem:[%s4622_s3 + $0xf0] sm:$0xff] }
  0xd0   : > { %3022 = vmatprep.subr.bf16.mxu0 %v3021_v51  ;;  %3038 = vmatprep.subr.bf16.mxu1 %v3037_v52  ;;  %v3057_v51 = vpack.c.bf16 %v2099_v43, %v2098_v42  ;;  %v3089_v52 = vpack.c.bf16 %v2131_v45, %v2130_v44  ;;  %v2109_v42 = vld [vmem:[%s4622_s3 + $0xf8] sm:$0xff]  ;;  %v2140_v43 = vld [vmem:[%s4622_s3 + $0x1f0] sm:$0xff] }
  0xd1   : > { %1745 = vmatprep.mubr.f32.mxu0 %v3290_v10  ;;  %1822 = vmatprep.mubr.f32.mxu1 %v3290_v10  ;;  %v3077_v44 = vpack.c.bf16 %v2109_v42, %v2108_v41  ;;  %v2141_v45 = vld [vmem:[%s4622_s3 + $0x1f8] sm:$0xff] }
  0xd2   : > { %2639 = vmatmul.mubr.msk.f32.gmra.mrb[2].mxu0 %vm300_vm2, %v1670_v0  ;;  %2641 = vmatmul.mubr.msk.f32.gmra.mrb[2].mxu1 %vm300_vm2, %v1670_v0  ;;  %v3093_v0 = vpack.c.bf16 %v2133_v55, %v2132_v57  ;;  %v2040_v57 = vld [vmem:[%s4621_s2] sm:$0xf] }
  0xd3   : > { %3024 = vmatpush1.bf16.msra.mxu0 %v3023_v59  ;;  %3040 = vmatpush1.bf16.msra.mxu1 %v3039_v61  ;;  %v2084_v61 = vld [vmem:[%s4622_s3 + $0x30] sm:$0xff] }
  0xd4   : > { %3026 = vmatprep.subr.bf16.mxu0 %v3025_v1  ;;  %3042 = vmatprep.subr.bf16.mxu1 %v3041_v2  ;;  %v2116_v1 = vld [vmem:[%s4622_s3 + $0x130] sm:$0xff]  ;;  %v2117_v2 = vld [vmem:[%s4622_s3 + $0x138] sm:$0xff]  ;;  %v3063_v6 = vpack.c.bf16 %v2085_v62, %v2084_v61 }
  0xd5   : > { %1942 = vmatprep.mubr.f32.mxu0 %v3290_v10  ;;  %2019 = vmatprep.mubr.f32.mxu1 %v3290_v10  ;;  %v3095_v7 = vpack.c.bf16 %v2117_v2, %v2116_v1 }
  0xd7   : > { %3028 = vmatpush1.bf16.msra.mxu0 %v3027_v8  ;;  %3044 = vmatpush1.bf16.msra.mxu1 %v3043_v11  ;;  %v2086_v8 = vld [vmem:[%s4622_s3 + $0x40] sm:$0xff]  ;;  %v2087_v11 = vld [vmem:[%s4622_s3 + $0x48] sm:$0xff] }
  0xd8   : > { %3030 = vmatprep.subr.bf16.mxu0 %v3029_v14  ;;  %3046 = vmatprep.subr.bf16.mxu1 %v3045_v15  ;;  %v2118_v14 = vld [vmem:[%s4622_s3 + $0x140] sm:$0xff]  ;;  %v2119_v15 = vld [vmem:[%s4622_s3 + $0x148] sm:$0xff]  ;;  %v3067_v19 = vpack.c.bf16 %v2087_v11, %v2086_v8 }
  0xd9   : > { %v3099_v29 = vpack.c.bf16 %v2119_v15, %v2118_v14 }
  0xdb   : > { %3032 = vmatpush1.bf16.msra.mxu0 %v3031_v20  ;;  %3048 = vmatpush1.bf16.msra.mxu1 %v3047_v21  ;;  %v2088_v20 = vld [vmem:[%s4622_s3 + $0x50] sm:$0xff]  ;;  %v2089_v21 = vld [vmem:[%s4622_s3 + $0x58] sm:$0xff] }
  0xdc   : > { %3050 = vmatprep.subr.bf16.mxu0 %v3049_v22  ;;  %3082 = vmatprep.subr.bf16.mxu1 %v3081_v23  ;;  %v3069_v22 = vpack.c.bf16 %v2105_v17, %v2104_v16  ;;  %v3101_v23 = vpack.c.bf16 %v2137_v9, %v2136_v18  ;;  %v3071_v32 = vpack.c.bf16 %v2089_v21, %v2088_v20 }
  0xde   : > { %2674 = vmatmul.mubr.msk.f32.vlgmr.msra.gmra.mrb[0].mxu0 %vm300_vm2, %v1871_v30  ;;  %2676 = vmatmul.mubr.msk.f32.vlgmr.msra.gmra.mrb[0].mxu1 %vm300_vm2, %v1871_v30  ;;  %v3073_v30 = vpack.c.bf16 %v2107_v27, %v2106_v26 }
  0xdf   : > { %1948 = vmatprep.mubr.f32.mxu0 %v3290_v10  ;;  %2025 = vmatprep.mubr.f32.mxu1 %v3290_v10  ;;  %v2114_v10 = vld [vmem:[%s4622_s3 + $0x120] sm:$0xff] }
  0xe0   : > { %3052 = vmatpush3.bf16.msra.mxu0 %v3051_v34  ;;  %3084 = vmatpush3.bf16.msra.mxu1 %v3083_v35  ;;  %v3091_v59 = vpack.c.bf16 %v2115_v53, %v2114_v10  ;;  %v3105_v34 = vpack.c.bf16 %v2139_v31, %v2138_v28  ;;  %v2090_v35 = vld [vmem:[%s4622_s3 + $0x60] sm:$0xff]  ;;  %v2042_v10 = vlaneseq }
  0xe1   : > { %3054 = vmatprep.subr.bf16.mxu0 %v3053_v38  ;;  %3086 = vmatprep.subr.bf16.mxu1 %v3085_v39  ;;  %v3075_v38 = vpack.c.bf16 %v2091_v36, %v2090_v35  ;;  %v2123_v39 = vld [vmem:[%s4622_s3 + $0x168] sm:$0xff] }
  0xe2   : > { %2675 = vmatmul.mubr.msk.f32.gmra.mrb[2].mxu0 %vm300_vm2, %v1873_v46  ;;  %2677 = vmatmul.mubr.msk.f32.gmra.mrb[2].mxu1 %vm300_vm2, %v1873_v46  ;;  %v3107_v40 = vpack.c.bf16 %v2123_v39, %v2122_v37  ;;  %v2092_v46 = vld [vmem:[%s4622_s3 + $0x70] sm:$0xff]  ;;  %v2043_v53 = vshrl.u32 %v2042_v10, 7 }
  0xe4   : > { %3056 = vmatpush3.bf16.msra.mxu0 %v3055_v47  ;;  %3088 = vmatpush3.bf16.msra.mxu1 %v3087_v48  ;;  %v2093_v47 = vld [vmem:[%s4622_s3 + $0x78] sm:$0xff]  ;;  %v3109_v48 = vpack.c.bf16 %v2141_v45, %v2140_v43  ;;  %v2044_v54 = vsub.s32 0, %v2043_v53  ;;  %v2052_v56 = vsub.s32 2, %v2043_v53  ;;  %v2048_v55 = vsub.s32 1, %v2043_v53 }
  0xe5   : > { %3058 = vmatprep.subr.bf16.mxu0 %v3057_v51  ;;  %3090 = vmatprep.subr.bf16.mxu1 %v3089_v52  ;;  %v3079_v49 = vpack.c.bf16 %v2093_v47, %v2092_v46  ;;  %v2125_v51 = vld [vmem:[%s4622_s3 + $0x178] sm:$0xff] }
  0xe6   : > { %v3111_v52 = vpack.c.bf16 %v2125_v51, %v2124_v50  ;;  %v2053_v61 = vrot.slane %v2040_v57, %v2052_v56  ;;  %v2049_v62 = vrot.slane %v2040_v57, %v2048_v55 }
  0xe8   : > { %3060 = vmatpush3.bf16.msra.mxu0 %v3059_v58  ;;  %3092 = vmatpush3.bf16.msra.mxu1 %v3091_v59  ;;  %v2056_v58 = vsub.s32 3, %v2043_v53  ;;  %v2045_v59 = vrot.slane %v2040_v57, %v2044_v54 }
  0xe9   : > { %3062 = vmatprep.subr.bf16.mxu0 %v3061_v63  ;;  %3094 = vmatprep.subr.bf16.mxu1 %v3093_v0 }
  0xea   : > { %v2057_v63 = vrot.slane %v2040_v57, %v2056_v58 }
  0xec   : > { %3064 = vmatpush3.bf16.msra.mxu0 %v3063_v6  ;;  %3096 = vmatpush3.bf16.msra.mxu1 %v3095_v7 }
  0xed   : > { %3066 = vmatprep.subr.bf16.mxu0 %v3065_v12  ;;  %3098 = vmatprep.subr.bf16.mxu1 %v3097_v13 }
  0xf0   : > { %3068 = vmatpush3.bf16.msra.mxu0 %v3067_v19  ;;  %3100 = vmatpush3.bf16.msra.mxu1 %v3099_v29 }
  0xf1   : > { %3070 = vmatprep.subr.bf16.mxu0 %v3069_v22  ;;  %3102 = vmatprep.subr.bf16.mxu1 %v3101_v23 }
  0xf4   : > { %3072 = vmatpush3.bf16.msra.mxu0 %v3071_v32  ;;  %3104 = vmatpush3.bf16.msra.mxu1 %v3103_v33 }
  0xf5   : > { %3074 = vmatprep.subr.bf16.mxu0 %v3073_v30  ;;  %3106 = vmatprep.subr.bf16.mxu1 %v3105_v34 }
  0xf8   : > { %3076 = vmatpush3.bf16.msra.mxu0 %v3075_v38  ;;  %3108 = vmatpush3.bf16.msra.mxu1 %v3107_v40 }
  0xf9   : > { %3078 = vmatprep.subr.bf16.mxu0 %v3077_v44  ;;  %3110 = vmatprep.subr.bf16.mxu1 %v3109_v48 }
  0xfc   : > { %3080 = vmatpush3.bf16.msra.mxu0 %v3079_v49  ;;  %3112 = vmatpush3.bf16.msra.mxu1 %v3111_v52 }
 0x1b1   : > { %v1944_v0 = vpop.f32.mrb[0].mxu0  ;;  %v2021_v1 = vpop.f32.mrb[0].mxu1 }
 0x1b2   : > { %v2062_v2 = vadd.f32 %v2045_v59, %v1944_v0  ;;  %v2064_v3 = vadd.f32 %v2053_v61, %v2021_v1  ;;  %v1946_v4 = vpop.f32.mrb[1].mxu0  ;;  %v2023_v60 = vpop.f32.mrb[1].mxu1 }
 0x1b3   : > { %v2063_v5 = vadd.f32 %v2049_v62, %v1946_v4  ;;  %v2065_v6 = vadd.f32 %v2057_v63, %v2023_v60 }
 0x1b4   : > { %v2070_v13 = vmax.f32 %v2062_v2, 0.0  ;;  %v2072_v14 = vmax.f32 %v2064_v3, 0.0 }
 0x1b5   : > { %v2071_v7 = vmax.f32 %v2063_v5, 0.0  ;;  %v2073_v8 = vmax.f32 %v2065_v6, 0.0  ;;  %v1950_v11 = vpop.f32.mrb[2].mxu0  ;;  %v2027_v12 = vpop.f32.mrb[2].mxu1 }
 0x1b6   : > { %v2066_v15 = vadd.f32 %v2045_v59, %v1950_v11  ;;  %v2068_v16 = vadd.f32 %v2053_v61, %v2027_v12  ;;  %v1952_v17 = vpop.f32.mrb[3].mxu0  ;;  %v2029_v18 = vpop.f32.mrb[3].mxu1 }
 0x1b7   : > { %v2067_v9 = vadd.f32 %v2049_v62, %v1952_v17  ;;  %v2069_v19 = vadd.f32 %v2057_v63, %v2029_v18  ;;  %2213 = vmatprep.mubr.f32.mxu0 %v2071_v7  ;;  %2288 = vmatprep.mubr.f32.mxu1 %v2073_v8 }
 0x1b8   : > { %2214 = vmatmul.mubr.f32.vlgmr.msra.gmra.mrb[4].mxu0 %v2070_v13  ;;  %2289 = vmatmul.mubr.f32.vlgmr.msra.gmra.mrb[4].mxu1 %v2072_v14  ;;  %v2074_v21 = vmax.f32 %v2066_v15, 0.0  ;;  %v2076_v22 = vmax.f32 %v2068_v16, 0.0 }
 0x1b9   : > { %v2075_v29 = vmax.f32 %v2067_v9, 0.0  ;;  %v2077_v20 = vmax.f32 %v2069_v19, 0.0 }
 0x1bb   : > { %2218 = vmatprep.mubr.f32.mxu0 %v2075_v29  ;;  %2293 = vmatprep.mubr.f32.mxu1 %v2077_v20 }
 0x1bc   : > { %2219 = vmatmul.mubr.f32.gmra.mrb[6].mxu0 %v2074_v21  ;;  %2294 = vmatmul.mubr.f32.gmra.mrb[6].mxu1 %v2076_v22 }
 0x28b   : > { %v2717_v23 = vpop.f32.mrb[4].mxu0  ;;  %v2755_v24 = vpop.f32.mrb[4].mxu1 }
 0x28c   : > { %v2718_v26 = vpop.f32.mrb[5].mxu0  ;;  %v2756_v27 = vpop.f32.mrb[5].mxu1 }
 0x28d   : > { %v2719_v28 = vadd.f32 %v2718_v26, %v2717_v23  ;;  %v2757_v31 = vadd.f32 %v2756_v27, %v2755_v24 }
 0x28f   : > { %v2216_v32 = vadd.f32 %v2719_v28, %v2678_v25  ;;  %v2720_v33 = vpop.f32.mrb[6].mxu0  ;;  %v2758_v30 = vpop.f32.mrb[6].mxu1 }
 0x290   : > { %v2721_v34 = vpop.f32.mrb[7].mxu0  ;;  %v2759_v35 = vpop.f32.mrb[7].mxu1 }
 0x291   : > { %v2291_v36 = vadd.f32 %v2757_v31, %v2216_v32  ;;  %v2722_v37 = vadd.f32 %v2721_v34, %v2720_v33  ;;  %v2760_v38 = vadd.f32 %v2759_v35, %v2758_v30 }
 0x293   : > { %3222 = vtanh.f32 %v2291_v36  ;;  %v2221_v39 = vadd.f32 %v2722_v37, %v2678_v25 }
 0x295   : > { %v2296_v40 = vadd.f32 %v2760_v38, %v2221_v39 }
 0x297   : > { %3224 = vtanh.f32 %v2296_v40 }
 0x29d   : > { %v3223_v41 = vpop.eup %3222 }
 0x29e   : > { %2302 = vst.msk [vmem:[%s217_s9] sm:$0xff] %vm2301_vm3, %v3223_v41 }
 0x2a1   : > { %v3225_v42 = vpop.eup %3224 }
 0x2a2   : > { %2303 = vst.msk [vmem:[%s217_s9 + $0x8] sm:$0xff] %vm2301_vm3, %v3225_v42 }
 0x2a3   : > { %3239 = shalt.err (!%p3236_p3)
}
 0x2a4   : > { %s3240_s25 = scalar_lea.hbm %s4574_s26, 256  ;;  %s3244_s30 = scalar_lea.hbm %s4624_s5, 512 }
 0x2a5   : > { %p3241_p4 = scmp.ne.s32.totalorder %s4574_s26, %s3240_s25  ;;  %p3245_p9 = scmp.lt.u32.totalorder %s4574_s26, %s4624_s5 }
 0x2a6   : > { %p3246_p10 = scmp.lt.u32.totalorder %s3244_s30, %s3240_s25  ;;  %p3248_p12 = scmp.lt.u32.totalorder %s3240_s25, %s4574_s26 }
 0x2a7   : > { %p3242_p7 = pnand %p3241_p4, %p3364_p5 }
 0x2a8   : > { %p3247_p11 = por %p3246_p10, %p3245_p9 }
 0x2a9   : > { %p3243_p8 = pneg %p3242_p7 }
 0x2aa   : > { %p3249_p13 = por %p3248_p12, %p3247_p11 }
 0x2ac   : > { %p3250_p0 = pnand %p3249_p13, %p3243_p8 }
 0x2ae   : > { %3253 = shalt.err (!%p3250_p0)
}
 0x2af   : > { %s3294_s8 = smov 128   ;;  %s3295_s9 = smov 8  }
 0x2b0   : > { %3178 = dma.vmem_to_hbm [thread:$0]  (%p3364_p5), %s4576_s10, 256, %s4574_s26, %s4578_s14, %s3294_s8, %s3294_s8, %s3295_s9  }
 0x2b1 PF: > { %p3184_p1 = scmp.ge.s32.totalorder %s3288_s21, 2  ;;  %s2333_s11 = sand.u32 1, %s3276_s18  }
 0x2b2   : > { %s2334_s13 = scalar_lea.sflag [#allocation3], %s2333_s11 }
 0x2b3   : > { %p3181_p2 = pnand %p3184_p1, %p3368_p6 }
 0x2b5   : > { %3271 = dma.done.wait (!%p3181_p2), %s2334_s13, 256  }
 0x2b6   : > { %3273 = vsyncadd (!%p3181_p2), %s2334_s13, 4294967040  ;;  %p15_p3 = scmp.ge.s32.totalorder %s3351_s24, 4   ;;  %s4627_s18 = smov %s3280_s19 }
 0x2b7   : > { %s4628_s19 = smov %s3284_s20  ;;  %s4629_s20 = smov %s3362_s27 }
 0x2b8   : > { %s4630_s21 = smov %s3351_s24  ;;  %17 = sbr.rel (!%p15_p3) target bundleno = 3 (0x3), region = 83 }
 0x2bf   :  { %2339 = vsyncpa [#allocation3], 1 }
 0x2c0   :  { %2341 = vsyncpa [#allocation3 + $0x1], 1 }

</bundles_post_ra>
